<compile_context>
chip_gen: v5e
topology: v5e:2x2
jax: 0.10.0
libtpu: 0.0.40
codegen_flags: <defaults>
</compile_context>

<pallas_src>
import jax
import jax.numpy as jnp
from jax.experimental import pallas as pl
from jax.experimental.pallas import tpu as pltpu


def _cdiv(a, b):
    return (a + b - 1) // b


def _round_up(v, m):
    return _cdiv(v, m) * m


def _vmem_budget_bytes():
    """Per-generation VMEM budget: ~75% of capacity, capped at 100 MiB.

    -> ~96 MiB on 128 MiB parts (v5e/v6e), ~48 MiB on the 64 MiB v7x.
    Falls back to a conservative 48 MiB if the query is unavailable."""
    cap = 64 * 1024 * 1024
    try:
        cap = int(pltpu.get_tpu_info().vmem_capacity_bytes)
    except Exception:
        pass
    return min(cap * 3 // 4, 100 * 1024 * 1024)


def _make_ffn_kernel(tf, slice_weights, use_scratch, single_f):
    """Build the fused FFN kernel for a (nm, nf) grid.

    slice_weights: weights are full VMEM-resident arrays; slice the f-chunk
                   in-kernel with pl.ds.  Otherwise the refs are already the
                   (dp_in, tf)/(tf, dp_out) tiles streamed by the pipeline.
    use_scratch:   accumulate in a f32 scratch (needed for sub-32-bit output).
    single_f:      nf == 1 -> straight-line compute, no accumulator at all.
    """

    def kernel(x_ref, w1_ref, b1_ref, w2_ref, b2_ref, o_ref, *scratch):
        acc_ref = scratch[0] if use_scratch else o_ref

        def partial_out(off):
            if slice_weights:
                w1 = w1_ref[:, pl.ds(off, tf)]
                b1 = b1_ref[:, pl.ds(off, tf)]
                w2 = w2_ref[pl.ds(off, tf), :]
            else:
                w1 = w1_ref[...]
                b1 = b1_ref[...]
                w2 = w2_ref[...]
            # linear1 + bias + ReLU: bf16 MXU operands, f32 accumulate and
            # f32 elementwise (v5e-safe).
            h = jnp.dot(x_ref[...], w1, preferred_element_type=jnp.float32) + b1
            h = jnp.maximum(h, 0.0)
            # TODO(synk): dropout is identity in eval mode; training-mode RNG
            # masking is intentionally not implemented.
            # linear2 partial product over this F chunk.
            return jnp.dot(h.astype(jnp.bfloat16), w2,
                           preferred_element_type=jnp.float32)

        if single_f:
            # One F step: compute and store directly, no accumulator RMW.
            o_ref[...] = (partial_out(0) + b2_ref[...]).astype(o_ref.dtype)
        else:
            f = pl.program_id(1)
            off = pl.multiple_of(f * tf, 128)

            @pl.when(f == 0)
            def _():
                # Initialise with the second bias: removes the final add pass.
                acc_ref[...] = jnp.broadcast_to(b2_ref[...], acc_ref.shape)

            acc_ref[...] += partial_out(off)

            if use_scratch:
                @pl.when(f == pl.num_programs(1) - 1)
                def _():
                    o_ref[...] = acc_ref[...].astype(o_ref.dtype)

    return kernel


def feed_forward(x, w1, b1, w2, b2, *, tm=None, tf=None):
    """Fused eval-mode FFN: (relu(x @ w1 + b1)) @ w2 + b2 in one pallas_call.

    x : (..., D)   w1 : (D, F)   b1 : (F,)   w2 : (F, D_out)   b2 : (D_out,)
    (w1/w2 are the transposed nn.Linear weights, i.e. (in, out) layout.)
    """
    *lead, d_in = x.shape
    f_dim = w1.shape[1]
    d_out = w2.shape[1]
    m = 1
    for s in lead:
        m *= s
    out_dtype = x.dtype

    budget = _vmem_budget_bytes()

    # ---- tile sizes & residency decision (all static Python) ----------------
    dp_in = _round_up(d_in, 128)
    dp_out = _round_up(d_out, 128)

    if tf is None:
        tf = 512 if f_dim > 512 else _round_up(f_dim, 128)
    tf = min(_round_up(tf, 128), _round_up(f_dim, 128))
    fp = _round_up(f_dim, tf)
    nf = fp // tf

    if tm is None:
        tm = 512
    if m < 2 * tm:
        # v7x megacore: keep at least 2 row tiles on the "parallel" axis
        # whenever m allows, so neither TensorCore idles.
        tm = max(8, _round_up(_cdiv(m, 2), 8))

    def vmem_bytes(resident_flag, tm_, tf_):
        n = 2 * tm_ * dp_in * 2            # x tile, bf16, double-buffered
        n += 2 * tm_ * dp_out * 4          # out tile, f32, double-buffered
        if resident_flag:
            n += 2 * (dp_in * fp + fp * dp_out) * 2 + 2 * (fp + dp_out) * 4
        else:
            n += 2 * (dp_in * tf_ + tf_ * dp_out) * 2 + 2 * (tf_ + dp_out) * 4
        n += tm_ * dp_out * 4              # (possible) f32 scratch accumulator
        n += tm_ * tf_ * 4                 # hidden (tm, tf) f32 intermediate
        return n

    # Keep the whole weight set VMEM-resident (fetched from HBM once for the
    # entire grid) whenever it fits the budget; otherwise stream weight tiles
    # and shrink the row tile / F tile until the streamed config fits.
    resident = vmem_bytes(True, tm, tf) <= budget
    if not resident:
        while vmem_bytes(False, tm, tf) > budget and tm > 128:
            tm = max(128, _round_up(tm // 2, 8))
        while vmem_bytes(False, tm, tf) > budget and tf > 256:
            tf = max(256, _round_up(tf // 2, 128))
        fp = _round_up(f_dim, tf)
        nf = fp // tf

    mp = _round_up(m, tm)
    nm = mp // tm
    single_f = nf == 1
    use_scratch = (not single_f) and (out_dtype != jnp.float32)
    slice_weights = resident and not single_f

    # ---- operand prep (no-ops when inputs are already aligned / bf16) -------
    # For repeated calls, hoist the weight/bias prep into a one-time step.
    x2 = x.reshape(m, d_in).astype(jnp.bfloat16)
    if mp != m or dp_in != d_in:
        x2 = jnp.pad(x2, ((0, mp - m), (0, dp_in - d_in)))

    w1p = w1.astype(jnp.bfloat16)
    if dp_in != d_in or fp != f_dim:
        w1p = jnp.pad(w1p, ((0, dp_in - d_in), (0, fp - f_dim)))
    w2p = w2.astype(jnp.bfloat16)
    if fp != f_dim or dp_out != d_out:
        w2p = jnp.pad(w2p, ((0, fp - f_dim), (0, dp_out - d_out)))

    b1p = b1.astype(jnp.float32).reshape(1, -1)
    if fp != f_dim:
        b1p = jnp.pad(b1p, ((0, 0), (0, fp - f_dim)))
    b2p = b2.astype(jnp.float32).reshape(1, -1)
    if dp_out != d_out:
        b2p = jnp.pad(b2p, ((0, 0), (0, dp_out - d_out)))

    # ---- BlockSpecs ----------------------------------------------------------
    x_spec = pl.BlockSpec((tm, dp_in), lambda i, f: (i, 0))      # resident over f
    if resident:
        w1_spec = pl.BlockSpec((dp_in, fp), lambda i, f: (0, 0))  # fetched once
        b1_spec = pl.BlockSpec((1, fp), lambda i, f: (0, 0))
        w2_spec = pl.BlockSpec((fp, dp_out), lambda i, f: (0, 0))
    else:
        w1_spec = pl.BlockSpec((dp_in, tf), lambda i, f: (0, f))  # streamed F tile
        b1_spec = pl.BlockSpec((1, tf), lambda i, f: (0, f))
        w2_spec = pl.BlockSpec((tf, dp_out), lambda i, f: (f, 0))
    b2_spec = pl.BlockSpec((1, dp_out), lambda i, f: (0, 0))
    out_spec = pl.BlockSpec((tm, dp_out), lambda i, f: (i, 0))

    scratch = [pltpu.VMEM((tm, dp_out), jnp.float32)] if use_scratch else []

    out = pl.pallas_call(
        _make_ffn_kernel(tf, slice_weights, use_scratch, single_f),
        out_shape=jax.ShapeDtypeStruct((mp, dp_out), out_dtype),
        grid_spec=pltpu.PrefetchScalarGridSpec(
            num_scalar_prefetch=0,
            grid=(nm, nf),
            in_specs=[x_spec, w1_spec, b1_spec, w2_spec, b2_spec],
            out_specs=out_spec,
            scratch_shapes=scratch,
        ),
        compiler_params=pltpu.CompilerParams(
            dimension_semantics=("parallel", "arbitrary"),
            vmem_limit_bytes=int(budget),
        ),
    )(x2, w1p, b1p, w2p, b2p)

    return out[:m, :d_out].reshape(*lead, d_out)


if __name__ == "__main__":
    # Small but lane-dense shapes: (batch, seq, dim_model), dim_ff = 4 * dim_model.
    B, T, D, F = 2, 256, 128, 512

    key = jax.random.PRNGKey(0)
    kx, k1, k2, k3, k4 = jax.random.split(key, 5)
    x = jax.random.normal(kx, (B, T, D), jnp.float32)
    # Weights stored bf16 (MXU-native, half the DMA bytes); biases f32.
    w1 = (0.05 * jax.random.normal(k1, (D, F), jnp.float32)).astype(jnp.bfloat16)
    b1 = 0.05 * jax.random.normal(k2, (F,), jnp.float32)
    w2 = (0.05 * jax.random.normal(k3, (F, D), jnp.float32)).astype(jnp.bfloat16)
    b2 = 0.05 * jax.random.normal(k4, (D,), jnp.float32)

    run = jax.jit(feed_forward)
    y = run(x, w1, b1, w2, b2)
    jax.block_until_ready(y)

    # Pure-JAX f32 reference (loose tolerance: in-kernel matmul operands are bf16).
    h_ref = jnp.maximum(x.reshape(-1, D) @ w1.astype(jnp.float32) + b1, 0.0)
    y_ref = (h_ref @ w2.astype(jnp.float32) + b2).reshape(B, T, D)
    err = float(jnp.max(jnp.abs(y - y_ref)))

    assert y.shape == (B, T, D) and y.dtype == jnp.float32
    assert err < 5e-2, f"max abs err {err}"
    print("KERNEL_OK")
</pallas_src>

<mosaic_0001>
module attributes {stable_mosaic.version = 11 : i64} {
  func.func @kernel(%arg0: i32, %arg1: i32, %arg2: memref<256x128xbf16, #tpu.memory_space<vmem>>, %arg3: memref<128x512xbf16, #tpu.memory_space<vmem>>, %arg4: memref<1x512xf32, #tpu.memory_space<vmem>>, %arg5: memref<512x128xbf16, #tpu.memory_space<vmem>>, %arg6: memref<1x128xf32, #tpu.memory_space<vmem>>, %arg7: memref<256x128xf32, #tpu.memory_space<vmem>>) attributes {dimension_semantics = [#tpu.dimension_semantics<parallel>, #tpu.dimension_semantics<arbitrary>], iteration_bounds = array<i64: 2, 1>, scalar_prefetch = 0 : i64, scratch_operands = 0 : i64, tpu.core_type = #tpu.core_type<tc>, window_params = [{transform_indices = @transform_0, window_bounds = array<i64: 256, 128>}, {pipeline_mode = #tpu.pipeline_mode<synchronous>, transform_indices = @transform_1, window_bounds = array<i64: 128, 512>}, {pipeline_mode = #tpu.pipeline_mode<synchronous>, transform_indices = @transform_2, window_bounds = array<i64: 1, 512>}, {pipeline_mode = #tpu.pipeline_mode<synchronous>, transform_indices = @transform_3, window_bounds = array<i64: 512, 128>}, {pipeline_mode = #tpu.pipeline_mode<synchronous>, transform_indices = @transform_4, window_bounds = array<i64: 1, 128>}, {transform_indices = @transform_5, window_bounds = array<i64: 256, 128>}]} {
    %c0 = arith.constant 0 : index
    %c0_0 = arith.constant 0 : index
    %0 = vector.load %arg3[%c0, %c0_0] : memref<128x512xbf16, #tpu.memory_space<vmem>>, vector<128x512xbf16>
    %c0_1 = arith.constant 0 : index
    %c0_2 = arith.constant 0 : index
    %1 = vector.load %arg4[%c0_1, %c0_2] : memref<1x512xf32, #tpu.memory_space<vmem>>, vector<1x512xf32>
    %c0_3 = arith.constant 0 : index
    %c0_4 = arith.constant 0 : index
    %2 = vector.load %arg5[%c0_3, %c0_4] : memref<512x128xbf16, #tpu.memory_space<vmem>>, vector<512x128xbf16>
    %c0_5 = arith.constant 0 : index
    %c0_6 = arith.constant 0 : index
    %3 = vector.load %arg2[%c0_5, %c0_6] : memref<256x128xbf16, #tpu.memory_space<vmem>>, vector<256x128xbf16>
    %cst = arith.constant dense<0.000000e+00> : vector<256x512xf32>
    %4 = tpu.matmul %3, %0, %cst {dimension_numbers = #tpu.dot_dimension_numbers<[1], [0], [0], [1], [0, 0, 1, 1], [], []>} : vector<256x128xbf16>, vector<128x512xbf16>, vector<256x512xf32> -> vector<256x512xf32>
    %5 = vector.broadcast %1 : vector<1x512xf32> to vector<256x512xf32>
    %6 = arith.addf %4, %5 : vector<256x512xf32>
    %cst_7 = arith.constant 0.000000e+00 : f32
    %7 = vector.broadcast %cst_7 : f32 to vector<256x512xf32>
    %8 = arith.maximumf %6, %7 : vector<256x512xf32>
    %9 = arith.truncf %8 : vector<256x512xf32> to vector<256x512xbf16>
    %cst_8 = arith.constant dense<0.000000e+00> : vector<256x128xf32>
    %10 = tpu.matmul %9, %2, %cst_8 {dimension_numbers = #tpu.dot_dimension_numbers<[1], [0], [0], [1], [0, 0, 1, 1], [], []>} : vector<256x512xbf16>, vector<512x128xbf16>, vector<256x128xf32> -> vector<256x128xf32>
    %c0_9 = arith.constant 0 : index
    %c0_10 = arith.constant 0 : index
    %11 = vector.load %arg6[%c0_9, %c0_10] : memref<1x128xf32, #tpu.memory_space<vmem>>, vector<1x128xf32>
    %12 = vector.broadcast %11 : vector<1x128xf32> to vector<256x128xf32>
    %13 = arith.addf %10, %12 : vector<256x128xf32>
    %c0_11 = arith.constant 0 : index
    %c0_12 = arith.constant 0 : index
    %14 = vector.load %arg7[%c0_11, %c0_12] : memref<256x128xf32, #tpu.memory_space<vmem>>, vector<256x128xf32>
    tpu.vector_store %arg7[%c0_11, %c0_12], %13 {strides = array<i32>} : memref<256x128xf32, #tpu.memory_space<vmem>>, vector<256x128xf32>,
    return
  }
  func.func @transform_0(%arg0: i32, %arg1: i32) -> (i32, i32) {
    %c0_i32 = arith.constant 0 : i32
    %c0_i32_0 = arith.constant 0 : i32
    return %arg0, %c0_i32 : i32, i32
  }
  func.func @transform_1(%arg0: i32, %arg1: i32) -> (i32, i32) {
    %c0_i32 = arith.constant 0 : i32
    %c0_i32_0 = arith.constant 0 : i32
    %c0_i32_1 = arith.constant 0 : i32
    return %c0_i32, %c0_i32_0 : i32, i32
  }
  func.func @transform_2(%arg0: i32, %arg1: i32) -> (i32, i32) {
    %c0_i32 = arith.constant 0 : i32
    %c0_i32_0 = arith.constant 0 : i32
    %c0_i32_1 = arith.constant 0 : i32
    return %c0_i32, %c0_i32_0 : i32, i32
  }
  func.func @transform_3(%arg0: i32, %arg1: i32) -> (i32, i32) {
    %c0_i32 = arith.constant 0 : i32
    %c0_i32_0 = arith.constant 0 : i32
    %c0_i32_1 = arith.constant 0 : i32
    return %c0_i32, %c0_i32_0 : i32, i32
  }
  func.func @transform_4(%arg0: i32, %arg1: i32) -> (i32, i32) {
    %c0_i32 = arith.constant 0 : i32
    %c0_i32_0 = arith.constant 0 : i32
    %c0_i32_1 = arith.constant 0 : i32
    return %c0_i32, %c0_i32_0 : i32, i32
  }
  func.func @transform_5(%arg0: i32, %arg1: i32) -> (i32, i32) {
    %c0_i32 = arith.constant 0 : i32
    %c0_i32_0 = arith.constant 0 : i32
    return %arg0, %c0_i32 : i32, i32
  }
}

</mosaic_0001>

<bundles_post_ra>
// kernel: feed_forward.1
= control target key start
LH: loop header
LB: loop body
LE: loop exit
PB: predicated region body
PF: predicated region fallthrough
CT: control target
= control target key end

     0   :  { %10 = vsyncpa [#allocation3], 0  ;;  %s3240_s0 = inlined_call_operand.vmem [shape: bf16[512,128], index: 0, kind: input, shape index: {}]   ;;  %s3241_s1 = inlined_call_operand.vmem [shape: bf16[128,512], index: 1, kind: input, shape index: {}]   ;;  %s3242_s2 = inlined_call_operand.vmem [shape: f32[1,512], index: 2, kind: input, shape index: {}]   ;;  %s3243_s3 = inlined_call_operand.vmem [shape: bf16[512,128], index: 3, kind: input, shape index: {}]   ;;  %s3244_s4 = inlined_call_operand.vmem [shape: f32[1,128], index: 4, kind: input, shape index: {}]   ;;  %s3245_s5 = inlined_call_operand.hbm [shape: f32[512,128], index: 5, kind: output, shape index: {}]  }
   0x1   :  { %12 = vsyncpa [#allocation3 + $0x1], 0  ;;  %s2431_s18 = smov 0   ;;  %s2433_s19 = smov 0  }
   0x2   :  { %s2435_s20 = smov 0   ;;  %s2437_s21 = smov 0  }
   0x3   :  { %s2439_s22 = smov 0   ;;  %s2441_s23 = smov 0  }
   0x4 LB: > { %s1847_s24 = sadd.s32 4294967295, %s2397_s23   ;;  %s1848_s25 = sadd.s32 4294967294, %s2397_s23   ;;  %s2397_s23 = sphi %s2441_s23, %s18_s23   ;;  %s2393_s22 = sphi %s2439_s22, %s3252_s22   ;;  %s2389_s21 = sphi %s2437_s21, %s3251_s21   ;;  %s2385_s20 = sphi %s2435_s20, %s3250_s20   ;;  %s2381_s19 = sphi %s2433_s19, %s3249_s19   ;;  %s2377_s18 = sphi %s2431_s18, %s3248_s18  }
   0x5   : > { %s30_s26 = sadd.s32 1, %s2393_s22  ;;  %s147_s27 = sadd.s32 1, %s2385_s20 }
   0x6   : > { %p32_p0 = scmp.ge.s32.totalorder %s30_s26, 2  ;;  %p157_p1 = scmp.ne.s32.totalorder %s2385_s20, %s2381_s19 }
   0x7   : > { %p158_p2 = scmp.eq.s32.totalorder %s1847_s24, 1  ;;  %p163_p3 = scmp.ne.s32.totalorder %s2381_s19, %s2377_s18 }
   0x8   : > { %s3254_s26 = smov (%p32_p0, %s30_s26), 0  ;;  %p164_p5 = scmp.eq.s32.totalorder %s1848_s25, 1 }
   0x9   : > { %p2471_p4 = por %p158_p2, %p157_p1  ;;  %s144_s29 = ssub.s32 %s2393_s22, %s3254_s26 }
   0xa   : > { %p1851_p6 = scmp.ge.s32.totalorder %s2397_s23, 1  ;;  %p145_p7 = scmp.eq.s32.totalorder %s144_s29, 0 }
   0xb   : > { %p2478_p8 = por %p164_p5, %p163_p3  ;;  %p203_p9 = scmp.lt.s32.totalorder %s2397_s23, 3 }
   0xc   : > { %s2484_s6 = scalar_select %p145_p7, %s2385_s20, %s147_s27  }
   0xd   : > { %p204_p10 = pnand %p1851_p6, %p203_p9 }
   0xe   : > { %s1853_s12 = sshll.u32 (!%p204_p10), %s2389_s21, 5  ;;  %s2260_s29 = sshll.u32 (!%p204_p10), %s2389_s21, 8 }
   0xf   : > { %207 = sbr.rel (%p204_p10) target bundleno = 699 (0x2bb), region = 40  ;;  %p232_p11 = scmp.lt.s32.totalorder (!%p204_p10), %s1853_s12, 63 }
  0x10   : > { %s1776_s8 = scalar_lea.hbm (!%p204_p10), %s3245_s5, %s2260_s29 }
  0x11   : > { %s1779_s10 = sshll.u32 (!%p204_p10), %s1776_s8, 4  ;;  %s1780_s10 = int_to_ptr.hbm [resolvable:$true] %s1779_s10 }
  0x12   : > { %s2333_s11 = sshra.s32 (!%p204_p10), %s1780_s10, 4  ;;  %s2334_s11 = int_to_ptr.hbm [resolvable:$true] %s2333_s11 }
  0x13   : > { %s2335_s13 = scalar_lea.hbm (!%p204_p10), %s2334_s11, 256  ;;  %p2340_p1 = scmp.lt.s32.totalorder (!%p204_p10), %s2334_s11, %s3245_s5 }
  0x14   : > { %v2033_v0 = vld [vmem:[%s3241_s1 + $0xe0] sm:$0xf]  ;;  %v2210_v1 = vld [vmem:[%s3241_s1 + $0xec] sm:$0xf0]  ;;  %v2208_v2 = vld [vmem:[%s3241_s1 + $0xe4] sm:$0xf]  ;;  %p2336_p12 = scmp.ne.s32.totalorder %s2334_s11, %s2335_s13 }
  0x15   : > { %v2034_v3 = vor.u32 %v2210_v1, %v2033_v0  ;;  %v2035_v4 = vld [vmem:[%s3241_s1 + $0xf0] sm:$0xf0]  ;;  %v2041_v5 = vld [vmem:[%s3241_s1 + $0xe8] sm:$0xf]  ;;  %v2211_v6 = vld [vmem:[%s3241_s1 + $0xf4] sm:$0xf0] }
  0x16   : > { %v2038_v7 = vor.u32 %v2208_v2, %v2035_v4  ;;  %v2042_v8 = vor.u32 %v2211_v6, %v2041_v5  ;;  %v2209_v9 = vld [vmem:[%s3241_s1 + $0xec] sm:$0xf]  ;;  %v2043_v10 = vld [vmem:[%s3241_s1 + $0xf8] sm:$0xf0]  ;;  %v2017_v11 = vld [vmem:[%s3241_s1 + $0xc0] sm:$0xf]  ;;  %p2337_p13 = pnand %p2336_p12, %p2471_p4 }
  0x17   : > { %632 = vmatpush.bf16.msra.mxu0 %v2034_v3  ;;  %v2046_v12 = vor.u32 %v2209_v9, %v2043_v10  ;;  %v2206_v13 = vld [vmem:[%s3241_s1 + $0xcc] sm:$0xf0]  ;;  %v2204_v14 = vld [vmem:[%s3241_s1 + $0xc4] sm:$0xf]  ;;  %v2019_v15 = vld [vmem:[%s3241_s1 + $0xd0] sm:$0xf0] }
  0x18   : > { %721 = vmatpush.bf16.msra.mxu1 %v2038_v7  ;;  %810 = vmatpush.bf16.msra.mxu2 %v2042_v8  ;;  %v2018_v16 = vor.u32 %v2206_v13, %v2017_v11  ;;  %v2022_v17 = vor.u32 %v2204_v14, %v2019_v15  ;;  %v2025_v18 = vld [vmem:[%s3241_s1 + $0xc8] sm:$0xf]  ;;  %v2207_v19 = vld [vmem:[%s3241_s1 + $0xd4] sm:$0xf0]  ;;  %v2205_v20 = vld [vmem:[%s3241_s1 + $0xcc] sm:$0xf]  ;;  %p2338_p0 = pneg %p2337_p13 }
  0x19   : > { %899 = vmatpush.bf16.msra.mxu3 %v2046_v12  ;;  %v2026_v21 = vor.u32 %v2207_v19, %v2025_v18  ;;  %v2027_v22 = vld [vmem:[%s3241_s1 + $0xd8] sm:$0xf0]  ;;  %v2001_v23 = vld [vmem:[%s3241_s1 + $0xa0] sm:$0xf]  ;;  %v2202_v24 = vld [vmem:[%s3241_s1 + $0xac] sm:$0xf0] }
  0x1a   : > { %v2030_v25 = vor.u32 %v2205_v20, %v2027_v22  ;;  %v2200_v26 = vld [vmem:[%s3241_s1 + $0xa4] sm:$0xf]  ;;  %v2003_v27 = vld [vmem:[%s3241_s1 + $0xb0] sm:$0xf0]  ;;  %v2009_v28 = vld [vmem:[%s3241_s1 + $0xa8] sm:$0xf]  ;;  %v2002_v29 = vor.u32 %v2202_v24, %v2001_v23 }
  0x1b   : > { %633 = vmatpush.bf16.msra.mxu0 %v2018_v16  ;;  %v2203_v30 = vld [vmem:[%s3241_s1 + $0xb4] sm:$0xf0]  ;;  %v2201_v31 = vld [vmem:[%s3241_s1 + $0xac] sm:$0xf]  ;;  %v2011_v32 = vld [vmem:[%s3241_s1 + $0xb8] sm:$0xf0]  ;;  %v2006_v33 = vor.u32 %v2200_v26, %v2003_v27 }
  0x1c   : > { %722 = vmatpush.bf16.msra.mxu1 %v2022_v17  ;;  %811 = vmatpush.bf16.msra.mxu2 %v2026_v21  ;;  %v2010_v34 = vor.u32 %v2203_v30, %v2009_v28  ;;  %v1985_v35 = vld [vmem:[%s3241_s1 + $0x80] sm:$0xf]  ;;  %v2198_v36 = vld [vmem:[%s3241_s1 + $0x8c] sm:$0xf0]  ;;  %v2196_v37 = vld [vmem:[%s3241_s1 + $0x84] sm:$0xf]  ;;  %v2014_v38 = vor.u32 %v2201_v31, %v2011_v32 }
  0x1d   : > { %900 = vmatpush.bf16.msra.mxu3 %v2030_v25  ;;  %v1987_v39 = vld [vmem:[%s3241_s1 + $0x90] sm:$0xf0]  ;;  %v1993_v40 = vld [vmem:[%s3241_s1 + $0x88] sm:$0xf]  ;;  %v2199_v41 = vld [vmem:[%s3241_s1 + $0x94] sm:$0xf0]  ;;  %v1986_v44 = vor.u32 %v2198_v36, %v1985_v35 }
  0x1e   : > { %v2197_v42 = vld [vmem:[%s3241_s1 + $0x8c] sm:$0xf]  ;;  %v1995_v43 = vld [vmem:[%s3241_s1 + $0x98] sm:$0xf0]  ;;  %v1990_v45 = vor.u32 %v2196_v37, %v1987_v39  ;;  %v1994_v46 = vor.u32 %v2199_v41, %v1993_v40  ;;  %v1969_v47 = vld [vmem:[%s3241_s1 + $0x60] sm:$0xf] }
  0x1f   : > { %634 = vmatpush.bf16.msra.mxu0 %v2002_v29  ;;  %v2194_v48 = vld [vmem:[%s3241_s1 + $0x6c] sm:$0xf0]  ;;  %v2192_v49 = vld [vmem:[%s3241_s1 + $0x64] sm:$0xf]  ;;  %v1998_v50 = vor.u32 %v2197_v42, %v1995_v43  ;;  %v1971_v51 = vld [vmem:[%s3241_s1 + $0x70] sm:$0xf0] }
  0x20   : > { %723 = vmatpush.bf16.msra.mxu1 %v2006_v33  ;;  %812 = vmatpush.bf16.msra.mxu2 %v2010_v34  ;;  %v1977_v52 = vld [vmem:[%s3241_s1 + $0x68] sm:$0xf]  ;;  %v2195_v53 = vld [vmem:[%s3241_s1 + $0x74] sm:$0xf0]  ;;  %v2193_v54 = vld [vmem:[%s3241_s1 + $0x6c] sm:$0xf]  ;;  %v1970_v56 = vor.u32 %v2194_v48, %v1969_v47  ;;  %v1974_v57 = vor.u32 %v2192_v49, %v1971_v51 }
  0x21   : > { %901 = vmatpush.bf16.msra.mxu3 %v2014_v38  ;;  %v1979_v55 = vld [vmem:[%s3241_s1 + $0x78] sm:$0xf0]  ;;  %v1978_v58 = vor.u32 %v2195_v53, %v1977_v52  ;;  %v1953_v59 = vld [vmem:[%s3241_s1 + $0x40] sm:$0xf]  ;;  %v2190_v60 = vld [vmem:[%s3241_s1 + $0x4c] sm:$0xf0] }
  0x22   : > { %v2188_v61 = vld [vmem:[%s3241_s1 + $0x44] sm:$0xf]  ;;  %v1982_v62 = vor.u32 %v2193_v54, %v1979_v55  ;;  %v1955_v63 = vld [vmem:[%s3241_s1 + $0x50] sm:$0xf0]  ;;  %v1961_v0 = vld [vmem:[%s3241_s1 + $0x48] sm:$0xf]  ;;  %v1954_v4 = vor.u32 %v2190_v60, %v1953_v59 }
  0x23   : > { %635 = vmatpush.bf16.msra.mxu0 %v1986_v44  ;;  %v2191_v1 = vld [vmem:[%s3241_s1 + $0x54] sm:$0xf0]  ;;  %v2189_v2 = vld [vmem:[%s3241_s1 + $0x4c] sm:$0xf]  ;;  %v1963_v3 = vld [vmem:[%s3241_s1 + $0x58] sm:$0xf0]  ;;  %v1958_v7 = vor.u32 %v2188_v61, %v1955_v63 }
  0x24   : > { %724 = vmatpush.bf16.msra.mxu1 %v1990_v45  ;;  %813 = vmatpush.bf16.msra.mxu2 %v1994_v46  ;;  %v1937_v5 = vld [vmem:[%s3241_s1 + $0x20] sm:$0xf]  ;;  %v2186_v6 = vld [vmem:[%s3241_s1 + $0x2c] sm:$0xf0]  ;;  %v1962_v8 = vor.u32 %v2191_v1, %v1961_v0  ;;  %v2184_v9 = vld [vmem:[%s3241_s1 + $0x24] sm:$0xf]  ;;  %v1966_v12 = vor.u32 %v2189_v2, %v1963_v3 }
  0x25   : > { %902 = vmatpush.bf16.msra.mxu3 %v1998_v50  ;;  %v1939_v10 = vld [vmem:[%s3241_s1 + $0x30] sm:$0xf0]  ;;  %v1945_v11 = vld [vmem:[%s3241_s1 + $0x28] sm:$0xf]  ;;  %v2187_v13 = vld [vmem:[%s3241_s1 + $0x34] sm:$0xf0]  ;;  %v1938_v16 = vor.u32 %v2186_v6, %v1937_v5 }
  0x26   : > { %v2185_v14 = vld [vmem:[%s3241_s1 + $0x2c] sm:$0xf]  ;;  %v1947_v15 = vld [vmem:[%s3241_s1 + $0x38] sm:$0xf0]  ;;  %v1921_v17 = vld [vmem:[%s3241_s1] sm:$0xf]  ;;  %v1942_v18 = vor.u32 %v2184_v9, %v1939_v10  ;;  %v1946_v19 = vor.u32 %v2187_v13, %v1945_v11 }
  0x27   : > { %636 = vmatpush.bf16.msra.mxu0 %v1970_v56  ;;  %v2182_v20 = vld [vmem:[%s3241_s1 + $0xc] sm:$0xf0]  ;;  %v2180_v21 = vld [vmem:[%s3241_s1 + $0x4] sm:$0xf]  ;;  %s3256_s12 = smov (!%p232_p11, %s1853_s12), 63  ;;  %v1950_v22 = vor.u32 %v2185_v14, %v1947_v15  ;;  %v2235_v32 = vld [vmem:[%s3243_s3 + $0xb8] sm:$0xff] }
  0x28   : > { %725 = vmatpush.bf16.msra.mxu1 %v1974_v57  ;;  %814 = vmatpush.bf16.msra.mxu2 %v1978_v58  ;;  %v1923_v23 = vld [vmem:[%s3241_s1 + $0x10] sm:$0xf0]  ;;  %v1929_v24 = vld [vmem:[%s3241_s1 + $0x8] sm:$0xf]  ;;  %v2183_v25 = vld [vmem:[%s3241_s1 + $0x14] sm:$0xf0]  ;;  %v1922_v28 = vor.u32 %v2182_v20, %v1921_v17 }
  0x29   : > { %903 = vmatpush.bf16.msra.mxu3 %v1982_v62  ;;  %v2181_v26 = vld [vmem:[%s3241_s1 + $0xc] sm:$0xf]  ;;  %v1931_v27 = vld [vmem:[%s3241_s1 + $0x18] sm:$0xf0]  ;;  %s1854_s17 = sshll.u32 %s3256_s12, 2  ;;  %v1926_v29 = vor.u32 %v2180_v21, %v1923_v23  ;;  %v1930_v30 = vor.u32 %v2183_v25, %v1929_v24  ;;  %v2234_v37 = vld [vmem:[%s3243_s3 + $0xb0] sm:$0xff] }
  0x2a   : > { %s2682_s27 = scalar_lea.vmem %s3240_s0, %s1854_s17  ;;  %v1934_v31 = vor.u32 %v2181_v26, %v1931_v27  ;;  %v2243_v34 = vld [vmem:[%s3243_s3 + $0xf8] sm:$0xff]  ;;  %v2218_v38 = vld [vmem:[%s3243_s3 + $0x30] sm:$0xff]  ;;  %v2233_v43 = vld [vmem:[%s3243_s3 + $0xa8] sm:$0xff]  ;;  %s228_s17 = sand.u32 1, %s2381_s19  }
  0x2b   : > { %637 = vmatpush.bf16.msra.mxu0 %v1954_v4  ;;  %v2244_v33 = vld [vmem:[%s2682_s27] sm:$0xff]  ;;  %v2219_v35 = vld [vmem:[%s3243_s3 + $0x38] sm:$0xff]  ;;  %v2242_v39 = vld [vmem:[%s3243_s3 + $0xf0] sm:$0xff]  ;;  %s1852_s24 = sshll.u32 %s228_s17, 8  ;;  %s1765_s21 = scalar_lea.sflag [#allocation3], %s228_s17 }
  0x2c   : > { %726 = vmatpush.bf16.msra.mxu1 %v1958_v7  ;;  %815 = vmatpush.bf16.msra.mxu2 %v1962_v8  ;;  %v2227_v36 = vld [vmem:[%s3243_s3 + $0x78] sm:$0xff]  ;;  %v2226_v40 = vld [vmem:[%s3243_s3 + $0x70] sm:$0xff]  ;;  %v2245_v41 = vld [vmem:[%s2682_s27 + $0x8] sm:$0xff]  ;;  %s3109_s25 = scalar_lea.vmem [#allocation2], %s1852_s24 }
  0x2d   : > { %904 = vmatpush.bf16.msra.mxu3 %v1966_v12  ;;  %v2246_v42 = vld [vmem:[%s2682_s27 + $0x10] sm:$0xff]  ;;  %v2217_v44 = vld [vmem:[%s3243_s3 + $0x28] sm:$0xff]  ;;  %v2247_v47 = vld [vmem:[%s2682_s27 + $0x18] sm:$0xff]  ;;  %s1777_s9 = sshll.u32 %s3109_s25, 4  ;;  %s1778_s9 = int_to_ptr.vmem [resolvable:$true] %s1777_s9 }
  0x2e   : > { %v2241_v45 = vld [vmem:[%s3243_s3 + $0xe8] sm:$0xff]  ;;  %v2248_v48 = vld [vmem:[%s2682_s27 + $0x20] sm:$0xff]  ;;  %v2250_v54 = vld [vmem:[%s2682_s27 + $0x30] sm:$0xff] }
  0x2f   : > { %638 = vmatpush.bf16.msra.mxu0 %v1938_v16  ;;  %v2225_v46 = vld [vmem:[%s3243_s3 + $0x68] sm:$0xff]  ;;  %v2232_v49 = vld [vmem:[%s3243_s3 + $0xa0] sm:$0xff]  ;;  %v2231_v55 = vld [vmem:[%s3243_s3 + $0x98] sm:$0xff] }
  0x30   : > { %727 = vmatpush.bf16.msra.mxu1 %v1942_v18  ;;  %816 = vmatpush.bf16.msra.mxu2 %v1946_v19  ;;  %v2216_v50 = vld [vmem:[%s3243_s3 + $0x20] sm:$0xff]  ;;  %v2249_v53 = vld [vmem:[%s2682_s27 + $0x28] sm:$0xff]  ;;  %v2215_v56 = vld [vmem:[%s3243_s3 + $0x18] sm:$0xff] }
  0x31   : > { %905 = vmatpush.bf16.msra.mxu3 %v1950_v22  ;;  %v2240_v51 = vld [vmem:[%s3243_s3 + $0xe0] sm:$0xff]  ;;  %v2239_v57 = vld [vmem:[%s3243_s3 + $0xd8] sm:$0xff]  ;;  %v2230_v2 = vld [vmem:[%s3243_s3 + $0x90] sm:$0xff] }
  0x32   : > { %v2224_v52 = vld [vmem:[%s3243_s3 + $0x60] sm:$0xff]  ;;  %v2223_v58 = vld [vmem:[%s3243_s3 + $0x58] sm:$0xff]  ;;  %v2214_v3 = vld [vmem:[%s3243_s3 + $0x10] sm:$0xff] }
  0x33   : > { %639 = vmatpush.bf16.msra.mxu0 %v1922_v28  ;;  %v2251_v59 = vld [vmem:[%s2682_s27 + $0x38] sm:$0xff]  ;;  %v2252_v60 = vld [vmem:[%s2682_s27 + $0x40] sm:$0xff]  ;;  %v2238_v4 = vld [vmem:[%s3243_s3 + $0xd0] sm:$0xff] }
  0x34   : > { %728 = vmatpush.bf16.msra.mxu1 %v1926_v29  ;;  %817 = vmatpush.bf16.msra.mxu2 %v1930_v30  ;;  %v270_v61 = vld [vmem:[%s3242_s2] sm:$0xf]  ;;  %v2222_v17 = vld [vmem:[%s3243_s3 + $0x50] sm:$0xff]  ;;  %v2253_v25 = vld [vmem:[%s2682_s27 + $0x48] sm:$0xff] }
  0x35   : > { %906 = vmatpush.bf16.msra.mxu3 %v1934_v31  ;;  %v2756_v0 = vperm.slane %v270_v61, 0  ;;  %v2758_v1 = vperm.slane %v270_v61, 1  ;;  %v2772_v12 = vperm.slane %v270_v61, 2  ;;  %v2775_v15 = vperm.slane %v270_v61, 3 }
  0x36   : > { %640 = vmatmul.bf16.vlgmr.msra.gmra.mxu0 %v2244_v33 }
  0x37   : > { %729 = vmatmul.bf16.vlgmr.msra.gmra.mxu1 %v2244_v33  ;;  %818 = vmatmul.bf16.vlgmr.msra.gmra.mxu2 %v2244_v33 }
  0x38   : > { %1554 = vmatpush.bf16.msrb.mxu2 %v2235_v32  ;;  %907 = vmatmul.bf16.vlgmr.msra.gmra.mxu3 %v2244_v33 }
  0x39   : > { %1643 = vmatpush.bf16.msrb.mxu3 %v2243_v34  ;;  %1376 = vmatpush.bf16.msrb.mxu0 %v2219_v35 }
  0x3a   : > { %1465 = vmatpush.bf16.msrb.mxu1 %v2227_v36 }
  0x3c   : > { %1555 = vmatpush.bf16.msrb.mxu2 %v2234_v37 }
  0x3d   : > { %1644 = vmatpush.bf16.msrb.mxu3 %v2242_v39  ;;  %1377 = vmatpush.bf16.msrb.mxu0 %v2218_v38 }
  0x3e   : > { %1466 = vmatpush.bf16.msrb.mxu1 %v2226_v40 }
  0x40   : > { %1556 = vmatpush.bf16.msrb.mxu2 %v2233_v43 }
  0x41   : > { %1378 = vmatpush.bf16.msrb.mxu0 %v2217_v44  ;;  %1645 = vmatpush.bf16.msrb.mxu3 %v2241_v45 }
  0x42   : > { %1467 = vmatpush.bf16.msrb.mxu1 %v2225_v46 }
  0x44   : > { %1557 = vmatpush.bf16.msrb.mxu2 %v2232_v49 }
  0x45   : > { %1379 = vmatpush.bf16.msrb.mxu0 %v2216_v50  ;;  %1646 = vmatpush.bf16.msrb.mxu3 %v2240_v51 }
  0x46   : > { %645 = vmatmul.bf16.gmra.mxu0 %v2245_v41  ;;  %1468 = vmatpush.bf16.msrb.mxu1 %v2224_v52 }
  0x47   : > { %734 = vmatmul.bf16.gmra.mxu1 %v2245_v41  ;;  %823 = vmatmul.bf16.gmra.mxu2 %v2245_v41 }
  0x48   : > { %912 = vmatmul.bf16.gmra.mxu3 %v2245_v41  ;;  %1558 = vmatpush.bf16.msrb.mxu2 %v2231_v55 }
  0x49   : > { %1380 = vmatpush.bf16.msrb.mxu0 %v2215_v56  ;;  %1647 = vmatpush.bf16.msrb.mxu3 %v2239_v57 }
  0x4a   : > { %1469 = vmatpush.bf16.msrb.mxu1 %v2223_v58 }
  0x4c   : > { %1559 = vmatpush.bf16.msrb.mxu2 %v2230_v2 }
  0x4d   : > { %1381 = vmatpush.bf16.msrb.mxu0 %v2214_v3  ;;  %1648 = vmatpush.bf16.msrb.mxu3 %v2238_v4  ;;  %v2229_v3 = vld [vmem:[%s3243_s3 + $0x88] sm:$0xff] }
  0x4e   : > { %1470 = vmatpush.bf16.msrb.mxu1 %v2222_v17  ;;  %v2213_v4 = vld [vmem:[%s3243_s3 + $0x8] sm:$0xff] }
  0x50   : > { %1560 = vmatpush.bf16.msrb.mxu2 %v2229_v3 }
  0x51   : > { %1382 = vmatpush.bf16.msrb.mxu0 %v2213_v4 }
  0x56   : > { %650 = vmatmul.bf16.gmra.mxu0 %v2246_v42 }
  0x57   : > { %739 = vmatmul.bf16.gmra.mxu1 %v2246_v42  ;;  %828 = vmatmul.bf16.gmra.mxu2 %v2246_v42 }
  0x58   : > { %917 = vmatmul.bf16.gmra.mxu3 %v2246_v42 }
  0x66   : > { %655 = vmatmul.bf16.gmra.mxu0 %v2247_v47 }
  0x67   : > { %744 = vmatmul.bf16.gmra.mxu1 %v2247_v47  ;;  %833 = vmatmul.bf16.gmra.mxu2 %v2247_v47 }
  0x68   : > { %922 = vmatmul.bf16.gmra.mxu3 %v2247_v47 }
  0x76   : > { %660 = vmatmul.bf16.gmra.mxu0 %v2248_v48 }
  0x77   : > { %749 = vmatmul.bf16.gmra.mxu1 %v2248_v48  ;;  %838 = vmatmul.bf16.gmra.mxu2 %v2248_v48 }
  0x78   : > { %927 = vmatmul.bf16.gmra.mxu3 %v2248_v48 }
  0x86   : > { %665 = vmatmul.bf16.gmra.mxu0 %v2249_v53 }
  0x87   : > { %754 = vmatmul.bf16.gmra.mxu1 %v2249_v53  ;;  %843 = vmatmul.bf16.gmra.mxu2 %v2249_v53 }
  0x88   : > { %932 = vmatmul.bf16.gmra.mxu3 %v2249_v53 }
  0x96   : > { %670 = vmatmul.bf16.gmra.mxu0 %v2250_v54 }
  0x97   : > { %759 = vmatmul.bf16.gmra.mxu1 %v2250_v54  ;;  %848 = vmatmul.bf16.gmra.mxu2 %v2250_v54 }
  0x98   : > { %937 = vmatmul.bf16.gmra.mxu3 %v2250_v54  ;;  %v2254_v54 = vld [vmem:[%s2682_s27 + $0x50] sm:$0xff] }
  0xa6   : > { %675 = vmatmul.bf16.gmra.mxu0 %v2251_v59 }
  0xa7   : > { %764 = vmatmul.bf16.gmra.mxu1 %v2251_v59  ;;  %853 = vmatmul.bf16.gmra.mxu2 %v2251_v59 }
  0xa8   : > { %942 = vmatmul.bf16.gmra.mxu3 %v2251_v59 }
  0xb3   : > { %v641_v62 = vpop.f32.mrf.mxu0 }
  0xb4   : > { %v730_v63 = vpop.f32.mrf.mxu1  ;;  %v642_v5 = vadd.f32 %v641_v62, %v2756_v0 }
  0xb5   : > { %v731_v7 = vadd.f32 %v730_v63, %v2758_v1 }
  0xb6   : > { %680 = vmatmul.bf16.gmra.mxu0 %v2252_v60  ;;  %v988_v14 = vmax.f32 %v642_v5, 0.0  ;;  %v2237_v5 = vld [vmem:[%s3243_s3 + $0xc8] sm:$0xff] }
  0xb7   : > { %769 = vmatmul.bf16.gmra.mxu1 %v2252_v60  ;;  %858 = vmatmul.bf16.gmra.mxu2 %v2252_v60  ;;  %v989_v18 = vmax.f32 %v731_v7, 0.0 }
  0xb8   : > { %947 = vmatmul.bf16.gmra.mxu3 %v2252_v60 }
  0xb9   : > { %1649 = vmatpush.bf16.msrb.mxu3 %v2237_v5 }
  0xba   : > { %v819_v6 = vpop.f32.mrf.mxu2 }
  0xbb   : > { %v908_v8 = vpop.f32.mrf.mxu3  ;;  %v643_v9 = vpop.f32.mrf.mxu0  ;;  %v820_v21 = vadd.f32 %v819_v6, %v2772_v12 }
  0xbc   : > { %v644_v10 = vadd.f32 %v643_v9, %v2756_v0  ;;  %v732_v11 = vpop.f32.mrf.mxu1  ;;  %v909_v23 = vadd.f32 %v908_v8, %v2775_v15 }
  0xbd   : > { %v733_v13 = vadd.f32 %v732_v11, %v2758_v1  ;;  %v990_v31 = vmax.f32 %v820_v21, 0.0 }
  0xbe   : > { %v992_v16 = vmax.f32 %v644_v10, 0.0  ;;  %v991_v33 = vmax.f32 %v909_v23, 0.0 }
  0xbf   : > { %v993_v19 = vmax.f32 %v733_v13, 0.0 }
  0xc0   : > { %v2780_v20 = vpack.c.bf16 %v992_v16, %v988_v14 }
  0xc1   : > { %v2783_v22 = vpack.c.bf16 %v993_v19, %v989_v18  ;;  %v2221_v19 = vld [vmem:[%s3243_s3 + $0x48] sm:$0xff] }
  0xc2   : > { %v821_v24 = vpop.f32.mrf.mxu2  ;;  %1471 = vmatpush.bf16.msrb.mxu1 %v2221_v19 }
  0xc3   : > { %v822_v26 = vadd.f32 %v821_v24, %v2772_v12  ;;  %v910_v27 = vpop.f32.mrf.mxu3  ;;  %v646_v28 = vpop.f32.mrf.mxu0 }
  0xc4   : > { %v911_v29 = vadd.f32 %v910_v27, %v2775_v15  ;;  %v735_v30 = vpop.f32.mrf.mxu1  ;;  %v647_v37 = vadd.f32 %v646_v28, %v2756_v0 }
  0xc5   : > { %v994_v32 = vmax.f32 %v822_v26, 0.0  ;;  %v736_v39 = vadd.f32 %v735_v30, %v2758_v1 }
  0xc6   : > { %v995_v34 = vmax.f32 %v911_v29, 0.0  ;;  %685 = vmatmul.bf16.gmra.mxu0 %v2253_v25  ;;  %v996_v45 = vmax.f32 %v647_v37, 0.0  ;;  %v2255_v29 = vld [vmem:[%s2682_s27 + $0x58] sm:$0xff] }
  0xc7   : > { %v2789_v35 = vpack.c.bf16 %v994_v32, %v990_v31  ;;  %774 = vmatmul.bf16.gmra.mxu1 %v2253_v25  ;;  %863 = vmatmul.bf16.gmra.mxu2 %v2253_v25  ;;  %v997_v47 = vmax.f32 %v736_v39, 0.0 }
  0xc8   : > { %v2791_v36 = vpack.c.bf16 %v995_v34, %v991_v33  ;;  %952 = vmatmul.bf16.gmra.mxu3 %v2253_v25 }
  0xca   : > { %v824_v38 = vpop.f32.mrf.mxu2 }
  0xcb   : > { %v913_v40 = vpop.f32.mrf.mxu3  ;;  %v648_v41 = vpop.f32.mrf.mxu0  ;;  %v825_v50 = vadd.f32 %v824_v38, %v2772_v12 }
  0xcc   : > { %v649_v42 = vadd.f32 %v648_v41, %v2756_v0  ;;  %v737_v43 = vpop.f32.mrf.mxu1  ;;  %v914_v52 = vadd.f32 %v913_v40, %v2775_v15 }
  0xcd   : > { %v738_v44 = vadd.f32 %v737_v43, %v2758_v1  ;;  %v998_v60 = vmax.f32 %v825_v50, 0.0 }
  0xce   : > { %v1000_v46 = vmax.f32 %v649_v42, 0.0  ;;  %v999_v62 = vmax.f32 %v914_v52, 0.0 }
  0xcf   : > { %v1001_v48 = vmax.f32 %v738_v44, 0.0 }
  0xd0   : > { %v2797_v49 = vpack.c.bf16 %v1000_v46, %v996_v45 }
  0xd1   : > { %v2800_v51 = vpack.c.bf16 %v1001_v48, %v997_v47 }
  0xd2   : > { %v826_v53 = vpop.f32.mrf.mxu2 }
  0xd3   : > { %v827_v55 = vadd.f32 %v826_v53, %v2772_v12  ;;  %v915_v56 = vpop.f32.mrf.mxu3  ;;  %v651_v57 = vpop.f32.mrf.mxu0 }
  0xd4   : > { %v916_v58 = vadd.f32 %v915_v56, %v2775_v15  ;;  %v740_v59 = vpop.f32.mrf.mxu1  ;;  %v652_v7 = vadd.f32 %v651_v57, %v2756_v0 }
  0xd5   : > { %v1002_v61 = vmax.f32 %v827_v55, 0.0  ;;  %v741_v9 = vadd.f32 %v740_v59, %v2758_v1 }
  0xd6   : > { %v1003_v63 = vmax.f32 %v916_v58, 0.0  ;;  %690 = vmatmul.bf16.gmra.mxu0 %v2254_v54  ;;  %v1004_v17 = vmax.f32 %v652_v7, 0.0 }
  0xd7   : > { %779 = vmatmul.bf16.gmra.mxu1 %v2254_v54  ;;  %868 = vmatmul.bf16.gmra.mxu2 %v2254_v54  ;;  %v2806_v2 = vpack.c.bf16 %v1002_v61, %v998_v60  ;;  %v1005_v21 = vmax.f32 %v741_v9, 0.0 }
  0xd8   : > { %957 = vmatmul.bf16.gmra.mxu3 %v2254_v54  ;;  %v2817_v6 = vpack.c.bf16 %v1003_v63, %v999_v62  ;;  %v2256_v62 = vld [vmem:[%s2682_s27 + $0x60] sm:$0xff] }
  0xda   : > { %v829_v8 = vpop.f32.mrf.mxu2 }
  0xdb   : > { %v918_v10 = vpop.f32.mrf.mxu3  ;;  %v653_v11 = vpop.f32.mrf.mxu0  ;;  %v830_v25 = vadd.f32 %v829_v8, %v2772_v12 }
  0xdc   : > { %v654_v13 = vadd.f32 %v653_v11, %v2756_v0  ;;  %v742_v14 = vpop.f32.mrf.mxu1  ;;  %v919_v27 = vadd.f32 %v918_v10, %v2775_v15 }
  0xdd   : > { %v743_v16 = vadd.f32 %v742_v14, %v2758_v1  ;;  %v1006_v37 = vmax.f32 %v830_v25, 0.0  ;;  %v2228_v14 = vld [vmem:[%s3243_s3 + $0x80] sm:$0xff] }
  0xde   : > { %v1008_v18 = vmax.f32 %v654_v13, 0.0  ;;  %v1007_v39 = vmax.f32 %v919_v27, 0.0  ;;  %1561 = vmatpush.bf16.msrb.mxu2 %v2228_v14 }
  0xdf   : > { %v1009_v23 = vmax.f32 %v743_v16, 0.0  ;;  %v2212_v16 = vld [vmem:[%s3243_s3] sm:$0xff] }
  0xe0   : > { %v2826_v24 = vpack.c.bf16 %v1008_v18, %v1004_v17  ;;  %v2236_v17 = vld [vmem:[%s3243_s3 + $0xc0] sm:$0xff]  ;;  %1383 = vmatpush.bf16.msrb.mxu0 %v2212_v16 }
  0xe1   : > { %v2829_v26 = vpack.c.bf16 %v1009_v23, %v1005_v21  ;;  %1650 = vmatpush.bf16.msrb.mxu3 %v2236_v17 }
  0xe2   : > { %v831_v28 = vpop.f32.mrf.mxu2 }
  0xe3   : > { %v832_v30 = vadd.f32 %v831_v28, %v2772_v12  ;;  %v920_v31 = vpop.f32.mrf.mxu3  ;;  %v656_v32 = vpop.f32.mrf.mxu0 }
  0xe4   : > { %v921_v33 = vadd.f32 %v920_v31, %v2775_v15  ;;  %v745_v34 = vpop.f32.mrf.mxu1  ;;  %v657_v43 = vadd.f32 %v656_v32, %v2756_v0 }
  0xe5   : > { %v1010_v38 = vmax.f32 %v832_v30, 0.0  ;;  %v746_v45 = vadd.f32 %v745_v34, %v2758_v1 }
  0xe6   : > { %v1011_v40 = vmax.f32 %v921_v33, 0.0  ;;  %695 = vmatmul.bf16.gmra.mxu0 %v2255_v29  ;;  %v1012_v53 = vmax.f32 %v657_v43, 0.0  ;;  %v2220_v33 = vld [vmem:[%s3243_s3 + $0x40] sm:$0xff] }
  0xe7   : > { %784 = vmatmul.bf16.gmra.mxu1 %v2255_v29  ;;  %873 = vmatmul.bf16.gmra.mxu2 %v2255_v29  ;;  %v2835_v41 = vpack.c.bf16 %v1010_v38, %v1006_v37  ;;  %v1013_v55 = vmax.f32 %v746_v45, 0.0  ;;  %v2257_v45 = vld [vmem:[%s2682_s27 + $0x68] sm:$0xff] }
  0xe8   : > { %962 = vmatmul.bf16.gmra.mxu3 %v2255_v29  ;;  %v2837_v42 = vpack.c.bf16 %v1011_v40, %v1007_v39  ;;  %1472 = vmatpush.bf16.msrb.mxu1 %v2220_v33 }
  0xea   : > { %v834_v44 = vpop.f32.mrf.mxu2 }
  0xeb   : > { %v923_v46 = vpop.f32.mrf.mxu3  ;;  %v658_v47 = vpop.f32.mrf.mxu0  ;;  %v835_v58 = vadd.f32 %v834_v44, %v2772_v12 }
  0xec   : > { %v659_v48 = vadd.f32 %v658_v47, %v2756_v0  ;;  %v747_v50 = vpop.f32.mrf.mxu1  ;;  %v924_v60 = vadd.f32 %v923_v46, %v2775_v15 }
  0xed   : > { %v748_v52 = vadd.f32 %v747_v50, %v2758_v1  ;;  %v1014_v8 = vmax.f32 %v835_v58, 0.0 }
  0xee   : > { %v1016_v54 = vmax.f32 %v659_v48, 0.0  ;;  %v1015_v10 = vmax.f32 %v924_v60, 0.0 }
  0xef   : > { %v1017_v56 = vmax.f32 %v748_v52, 0.0 }
  0xf0   : > { %v2843_v57 = vpack.c.bf16 %v1016_v54, %v1012_v53 }
  0xf1   : > { %v2846_v59 = vpack.c.bf16 %v1017_v56, %v1013_v55 }
  0xf2   : > { %v836_v61 = vpop.f32.mrf.mxu2 }
  0xf3   : > { %v837_v63 = vadd.f32 %v836_v61, %v2772_v12  ;;  %v925_v3 = vpop.f32.mrf.mxu3  ;;  %v661_v4 = vpop.f32.mrf.mxu0 }
  0xf4   : > { %v926_v5 = vadd.f32 %v925_v3, %v2775_v15  ;;  %v750_v7 = vpop.f32.mrf.mxu1  ;;  %v662_v19 = vadd.f32 %v661_v4, %v2756_v0 }
  0xf5   : > { %v1018_v9 = vmax.f32 %v837_v63, 0.0  ;;  %v751_v23 = vadd.f32 %v750_v7, %v2758_v1 }
  0xf6   : > { %v1019_v11 = vmax.f32 %v926_v5, 0.0  ;;  %700 = vmatmul.bf16.gmra.mxu0 %v2256_v62  ;;  %v1020_v31 = vmax.f32 %v662_v19, 0.0 }
  0xf7   : > { %789 = vmatmul.bf16.gmra.mxu1 %v2256_v62  ;;  %878 = vmatmul.bf16.gmra.mxu2 %v2256_v62  ;;  %v2852_v13 = vpack.c.bf16 %v1018_v9, %v1014_v8  ;;  %v1021_v34 = vmax.f32 %v751_v23, 0.0 }
  0xf8   : > { %967 = vmatmul.bf16.gmra.mxu3 %v2256_v62  ;;  %v2863_v18 = vpack.c.bf16 %v1019_v11, %v1015_v10 }
  0xfa   : > { %v839_v21 = vpop.f32.mrf.mxu2 }
  0xfb   : > { %v928_v25 = vpop.f32.mrf.mxu3  ;;  %v663_v27 = vpop.f32.mrf.mxu0  ;;  %v840_v39 = vadd.f32 %v839_v21, %v2772_v12 }
  0xfc   : > { %v664_v28 = vadd.f32 %v663_v27, %v2756_v0  ;;  %v752_v29 = vpop.f32.mrf.mxu1  ;;  %v929_v43 = vadd.f32 %v928_v25, %v2775_v15  ;;  %v2258_v25 = vld [vmem:[%s2682_s27 + $0x70] sm:$0xff] }
  0xfd   : > { %v753_v30 = vadd.f32 %v752_v29, %v2758_v1  ;;  %v1022_v53 = vmax.f32 %v840_v39, 0.0 }
  0xfe   : > { %v1024_v32 = vmax.f32 %v664_v28, 0.0  ;;  %v1023_v55 = vmax.f32 %v929_v43, 0.0 }
  0xff   : > { %v1025_v37 = vmax.f32 %v753_v30, 0.0 }
 0x100   : > { %v2872_v38 = vpack.c.bf16 %v1024_v32, %v1020_v31 }
 0x101   : > { %v2875_v40 = vpack.c.bf16 %v1025_v37, %v1021_v34 }
 0x102   : > { %v841_v44 = vpop.f32.mrf.mxu2 }
 0x103   : > { %v842_v46 = vadd.f32 %v841_v44, %v2772_v12  ;;  %v930_v47 = vpop.f32.mrf.mxu3  ;;  %v666_v48 = vpop.f32.mrf.mxu0 }
 0x104   : > { %v931_v50 = vadd.f32 %v930_v47, %v2775_v15  ;;  %v755_v52 = vpop.f32.mrf.mxu1  ;;  %v667_v61 = vadd.f32 %v666_v48, %v2756_v0 }
 0x105   : > { %v1026_v54 = vmax.f32 %v842_v46, 0.0  ;;  %v756_v63 = vadd.f32 %v755_v52, %v2758_v1 }
 0x106   : > { %v1027_v56 = vmax.f32 %v931_v50, 0.0  ;;  %705 = vmatmul.bf16.gmra.mxu0 %v2257_v45  ;;  %v1028_v9 = vmax.f32 %v667_v61, 0.0 }
 0x107   : > { %794 = vmatmul.bf16.gmra.mxu1 %v2257_v45  ;;  %883 = vmatmul.bf16.gmra.mxu2 %v2257_v45  ;;  %v2881_v58 = vpack.c.bf16 %v1026_v54, %v1022_v53  ;;  %v1029_v11 = vmax.f32 %v756_v63, 0.0 }
 0x108   : > { %972 = vmatmul.bf16.gmra.mxu3 %v2257_v45  ;;  %v2883_v60 = vpack.c.bf16 %v1027_v56, %v1023_v55 }
 0x10a   : > { %v844_v62 = vpop.f32.mrf.mxu2 }
 0x10b   : > { %v933_v3 = vpop.f32.mrf.mxu3  ;;  %v668_v4 = vpop.f32.mrf.mxu0  ;;  %v845_v17 = vadd.f32 %v844_v62, %v2772_v12 }
 0x10c   : > { %v669_v5 = vadd.f32 %v668_v4, %v2756_v0  ;;  %v757_v7 = vpop.f32.mrf.mxu1  ;;  %v934_v21 = vadd.f32 %v933_v3, %v2775_v15 }
 0x10d   : > { %v758_v8 = vadd.f32 %v757_v7, %v2758_v1  ;;  %v1030_v32 = vmax.f32 %v845_v17, 0.0  ;;  %v2259_v7 = vld [vmem:[%s2682_s27 + $0x78] sm:$0xff]  ;;  %s2339_s27 = scalar_lea.hbm %s3245_s5, 512 }
 0x10e   : > { %v1032_v10 = vmax.f32 %v669_v5, 0.0  ;;  %v1031_v34 = vmax.f32 %v934_v21, 0.0  ;;  %p2341_p2 = scmp.lt.s32.totalorder %s2339_s27, %s2335_s13 }
 0x10f   : > { %v1033_v14 = vmax.f32 %v758_v8, 0.0 }
 0x110   : > { %v2889_v16 = vpack.c.bf16 %v1032_v10, %v1028_v9  ;;  %p2342_p3 = por %p2341_p2, %p2340_p1 }
 0x111   : > { %v2892_v19 = vpack.c.bf16 %v1033_v14, %v1029_v11 }
 0x112   : > { %v846_v23 = vpop.f32.mrf.mxu2  ;;  %p2343_p5 = pnand %p2342_p3, %p2338_p0 }
 0x113   : > { %v847_v27 = vadd.f32 %v846_v23, %v2772_v12  ;;  %v935_v28 = vpop.f32.mrf.mxu3  ;;  %v671_v29 = vpop.f32.mrf.mxu0 }
 0x114   : > { %v936_v30 = vadd.f32 %v935_v28, %v2775_v15  ;;  %v760_v31 = vpop.f32.mrf.mxu1  ;;  %v672_v44 = vadd.f32 %v671_v29, %v2756_v0 }
 0x115   : > { %v1034_v33 = vmax.f32 %v847_v27, 0.0  ;;  %v761_v46 = vadd.f32 %v760_v31, %v2758_v1 }
 0x116   : > { %v1035_v37 = vmax.f32 %v936_v30, 0.0  ;;  %710 = vmatmul.bf16.gmra.mxu0 %v2258_v25  ;;  %v1036_v54 = vmax.f32 %v672_v44, 0.0 }
 0x117   : > { %799 = vmatmul.bf16.gmra.mxu1 %v2258_v25  ;;  %888 = vmatmul.bf16.gmra.mxu2 %v2258_v25  ;;  %v2898_v39 = vpack.c.bf16 %v1034_v33, %v1030_v32  ;;  %v1037_v56 = vmax.f32 %v761_v46, 0.0 }
 0x118   : > { %977 = vmatmul.bf16.gmra.mxu3 %v2258_v25  ;;  %v2900_v43 = vpack.c.bf16 %v1035_v37, %v1031_v34 }
 0x11a   : > { %v849_v45 = vpop.f32.mrf.mxu2 }
 0x11b   : > { %v938_v47 = vpop.f32.mrf.mxu3  ;;  %v673_v48 = vpop.f32.mrf.mxu0  ;;  %v850_v63 = vadd.f32 %v849_v45, %v2772_v12 }
 0x11c   : > { %v674_v50 = vadd.f32 %v673_v48, %v2756_v0  ;;  %v762_v52 = vpop.f32.mrf.mxu1  ;;  %v939_v4 = vadd.f32 %v938_v47, %v2775_v15 }
 0x11d   : > { %v763_v53 = vadd.f32 %v762_v52, %v2758_v1  ;;  %v1038_v17 = vmax.f32 %v850_v63, 0.0 }
 0x11e   : > { %v1040_v55 = vmax.f32 %v674_v50, 0.0  ;;  %v1039_v23 = vmax.f32 %v939_v4, 0.0 }
 0x11f   : > { %v1041_v61 = vmax.f32 %v763_v53, 0.0 }
 0x120   : > { %v2906_v62 = vpack.c.bf16 %v1040_v55, %v1036_v54 }
 0x121   : > { %v2909_v3 = vpack.c.bf16 %v1041_v61, %v1037_v56 }
 0x122   : > { %v851_v5 = vpop.f32.mrf.mxu2 }
 0x123   : > { %v852_v8 = vadd.f32 %v851_v5, %v2772_v12  ;;  %v940_v9 = vpop.f32.mrf.mxu3  ;;  %v676_v10 = vpop.f32.mrf.mxu0 }
 0x124   : > { %v941_v11 = vadd.f32 %v940_v9, %v2775_v15  ;;  %v765_v14 = vpop.f32.mrf.mxu1  ;;  %v677_v29 = vadd.f32 %v676_v10, %v2756_v0 }
 0x125   : > { %v1042_v21 = vmax.f32 %v852_v8, 0.0  ;;  %v766_v31 = vadd.f32 %v765_v14, %v2758_v1 }
 0x126   : > { %v1043_v25 = vmax.f32 %v941_v11, 0.0  ;;  %715 = vmatmul.bf16.gmra.mxu0 %v2259_v7  ;;  %v1044_v45 = vmax.f32 %v677_v29, 0.0 }
 0x127   : > { %804 = vmatmul.bf16.gmra.mxu1 %v2259_v7  ;;  %893 = vmatmul.bf16.gmra.mxu2 %v2259_v7  ;;  %v2915_v27 = vpack.c.bf16 %v1042_v21, %v1038_v17  ;;  %v1045_v47 = vmax.f32 %v766_v31, 0.0 }
 0x128   : > { %982 = vmatmul.bf16.gmra.mxu3 %v2259_v7  ;;  %v2917_v28 = vpack.c.bf16 %v1043_v25, %v1039_v23 }
 0x12a   : > { %v854_v30 = vpop.f32.mrf.mxu2 }
 0x12b   : > { %v943_v32 = vpop.f32.mrf.mxu3  ;;  %v678_v33 = vpop.f32.mrf.mxu0  ;;  %v855_v52 = vadd.f32 %v854_v30, %v2772_v12 }
 0x12c   : > { %v679_v34 = vadd.f32 %v678_v33, %v2756_v0  ;;  %v767_v37 = vpop.f32.mrf.mxu1  ;;  %v944_v54 = vadd.f32 %v943_v32, %v2775_v15 }
 0x12d   : > { %v768_v44 = vadd.f32 %v767_v37, %v2758_v1  ;;  %v1046_v7 = vmax.f32 %v855_v52, 0.0 }
 0x12e   : > { %v1048_v46 = vmax.f32 %v679_v34, 0.0  ;;  %v1047_v9 = vmax.f32 %v944_v54, 0.0 }
 0x12f   : > { %v1049_v48 = vmax.f32 %v768_v44, 0.0 }
 0x130   : > { %v2923_v50 = vpack.c.bf16 %v1048_v46, %v1044_v45 }
 0x131   : > { %v2926_v53 = vpack.c.bf16 %v1049_v48, %v1045_v47 }
 0x132   : > { %v856_v55 = vpop.f32.mrf.mxu2 }
 0x133   : > { %v857_v56 = vadd.f32 %v856_v55, %v2772_v12  ;;  %v945_v61 = vpop.f32.mrf.mxu3  ;;  %v681_v63 = vpop.f32.mrf.mxu0 }
 0x134   : > { %v946_v4 = vadd.f32 %v945_v61, %v2775_v15  ;;  %v770_v5 = vpop.f32.mrf.mxu1  ;;  %v682_v17 = vadd.f32 %v681_v63, %v2756_v0 }
 0x135   : > { %v1050_v8 = vmax.f32 %v857_v56, 0.0  ;;  %v771_v23 = vadd.f32 %v770_v5, %v2758_v1 }
 0x136   : > { %v1051_v10 = vmax.f32 %v946_v4, 0.0  ;;  %1384 = vmatmul.bf16.vlgmr.msrb.gmra.mxu0 %v2780_v20  ;;  %v1052_v31 = vmax.f32 %v682_v17, 0.0 }
 0x137   : > { %1473 = vmatmul.bf16.vlgmr.msrb.gmra.mxu1 %v2783_v22  ;;  %1562 = vmatmul.bf16.vlgmr.msrb.gmra.mxu2 %v2789_v35  ;;  %v2934_v11 = vpack.c.bf16 %v1050_v8, %v1046_v7  ;;  %v1053_v32 = vmax.f32 %v771_v23, 0.0 }
 0x138   : > { %1651 = vmatmul.bf16.vlgmr.msrb.gmra.mxu3 %v2791_v36  ;;  %v2937_v14 = vpack.c.bf16 %v1051_v10, %v1047_v9 }
 0x13a   : > { %v859_v21 = vpop.f32.mrf.mxu2 }
 0x13b   : > { %v948_v25 = vpop.f32.mrf.mxu3  ;;  %v683_v29 = vpop.f32.mrf.mxu0  ;;  %v860_v36 = vadd.f32 %v859_v21, %v2772_v12 }
 0x13c   : > { %v684_v30 = vadd.f32 %v683_v29, %v2756_v0  ;;  %v772_v20 = vpop.f32.mrf.mxu1  ;;  %v949_v44 = vadd.f32 %v948_v25, %v2775_v15 }
 0x13d   : > { %v773_v22 = vadd.f32 %v772_v20, %v2758_v1  ;;  %v1054_v55 = vmax.f32 %v860_v36, 0.0 }
 0x13e   : > { %v1056_v35 = vmax.f32 %v684_v30, 0.0  ;;  %v1055_v61 = vmax.f32 %v949_v44, 0.0 }
 0x13f   : > { %v1057_v33 = vmax.f32 %v773_v22, 0.0 }
 0x140   : > { %v2943_v34 = vpack.c.bf16 %v1056_v35, %v1052_v31 }
 0x141   : > { %v2946_v37 = vpack.c.bf16 %v1057_v33, %v1053_v32 }
 0x142   : > { %v861_v45 = vpop.f32.mrf.mxu2 }
 0x143   : > { %v862_v46 = vadd.f32 %v861_v45, %v2772_v12  ;;  %v950_v47 = vpop.f32.mrf.mxu3  ;;  %v686_v48 = vpop.f32.mrf.mxu0 }
 0x144   : > { %v951_v52 = vadd.f32 %v950_v47, %v2775_v15  ;;  %v775_v54 = vpop.f32.mrf.mxu1  ;;  %v687_v7 = vadd.f32 %v686_v48, %v2756_v0 }
 0x145   : > { %v1058_v56 = vmax.f32 %v862_v46, 0.0  ;;  %v776_v9 = vadd.f32 %v775_v54, %v2758_v1 }
 0x146   : > { %v1059_v63 = vmax.f32 %v951_v52, 0.0  ;;  %1389 = vmatmul.bf16.gmra.mxu0 %v2797_v49  ;;  %v1060_v23 = vmax.f32 %v687_v7, 0.0 }
 0x147   : > { %1478 = vmatmul.bf16.gmra.mxu1 %v2800_v51  ;;  %1567 = vmatmul.bf16.gmra.mxu2 %v2806_v2  ;;  %v2954_v4 = vpack.c.bf16 %v1058_v56, %v1054_v55  ;;  %v1061_v25 = vmax.f32 %v776_v9, 0.0 }
 0x148   : > { %1656 = vmatmul.bf16.gmra.mxu3 %v2817_v6  ;;  %v2957_v5 = vpack.c.bf16 %v1059_v63, %v1055_v61 }
 0x14a   : > { %v864_v8 = vpop.f32.mrf.mxu2 }
 0x14b   : > { %v953_v10 = vpop.f32.mrf.mxu3  ;;  %v688_v17 = vpop.f32.mrf.mxu0  ;;  %v865_v6 = vadd.f32 %v864_v8, %v2772_v12 }
 0x14c   : > { %v689_v21 = vadd.f32 %v688_v17, %v2756_v0  ;;  %v777_v49 = vpop.f32.mrf.mxu1  ;;  %v954_v22 = vadd.f32 %v953_v10, %v2775_v15 }
 0x14d   : > { %v778_v51 = vadd.f32 %v777_v49, %v2758_v1  ;;  %v1062_v45 = vmax.f32 %v865_v6, 0.0 }
 0x14e   : > { %v1064_v2 = vmax.f32 %v689_v21, 0.0  ;;  %v1063_v47 = vmax.f32 %v954_v22, 0.0 }
 0x14f   : > { %v1065_v29 = vmax.f32 %v778_v51, 0.0 }
 0x150   : > { %v2963_v30 = vpack.c.bf16 %v1064_v2, %v1060_v23 }
 0x151   : > { %v2966_v20 = vpack.c.bf16 %v1065_v29, %v1061_v25 }
 0x152   : > { %v866_v31 = vpop.f32.mrf.mxu2 }
 0x153   : > { %v867_v35 = vadd.f32 %v866_v31, %v2772_v12  ;;  %v955_v32 = vpop.f32.mrf.mxu3  ;;  %v691_v33 = vpop.f32.mrf.mxu0 }
 0x154   : > { %v956_v36 = vadd.f32 %v955_v32, %v2775_v15  ;;  %v780_v44 = vpop.f32.mrf.mxu1  ;;  %v692_v55 = vadd.f32 %v691_v33, %v2756_v0 }
 0x155   : > { %v1066_v46 = vmax.f32 %v867_v35, 0.0  ;;  %v781_v61 = vadd.f32 %v780_v44, %v2758_v1 }
 0x156   : > { %v1067_v48 = vmax.f32 %v956_v36, 0.0  ;;  %1394 = vmatmul.bf16.gmra.mxu0 %v2826_v24  ;;  %v1068_v9 = vmax.f32 %v692_v55, 0.0 }
 0x157   : > { %1483 = vmatmul.bf16.gmra.mxu1 %v2829_v26  ;;  %1572 = vmatmul.bf16.gmra.mxu2 %v2835_v41  ;;  %v2974_v52 = vpack.c.bf16 %v1066_v46, %v1062_v45  ;;  %v1069_v10 = vmax.f32 %v781_v61, 0.0 }
 0x158   : > { %1661 = vmatmul.bf16.gmra.mxu3 %v2837_v42  ;;  %v2977_v54 = vpack.c.bf16 %v1067_v48, %v1063_v47 }
 0x15a   : > { %v869_v56 = vpop.f32.mrf.mxu2 }
 0x15b   : > { %v958_v63 = vpop.f32.mrf.mxu3  ;;  %v693_v7 = vpop.f32.mrf.mxu0  ;;  %v870_v42 = vadd.f32 %v869_v56, %v2772_v12 }
 0x15c   : > { %v694_v8 = vadd.f32 %v693_v7, %v2756_v0  ;;  %v782_v24 = vpop.f32.mrf.mxu1  ;;  %v959_v51 = vadd.f32 %v958_v63, %v2775_v15 }
 0x15d   : > { %v783_v26 = vadd.f32 %v782_v24, %v2758_v1  ;;  %v1070_v31 = vmax.f32 %v870_v42, 0.0 }
 0x15e   : > { %v1072_v41 = vmax.f32 %v694_v8, 0.0  ;;  %v1071_v32 = vmax.f32 %v959_v51, 0.0 }
 0x15f   : > { %v1073_v17 = vmax.f32 %v783_v26, 0.0 }
 0x160   : > { %v2983_v21 = vpack.c.bf16 %v1072_v41, %v1068_v9 }
 0x161   : > { %v2986_v49 = vpack.c.bf16 %v1073_v17, %v1069_v10 }
 0x162   : > { %v871_v23 = vpop.f32.mrf.mxu2 }
 0x163   : > { %v872_v2 = vadd.f32 %v871_v23, %v2772_v12  ;;  %v960_v25 = vpop.f32.mrf.mxu3  ;;  %v696_v29 = vpop.f32.mrf.mxu0 }
 0x164   : > { %v961_v6 = vadd.f32 %v960_v25, %v2775_v15  ;;  %v785_v22 = vpop.f32.mrf.mxu1  ;;  %v697_v45 = vadd.f32 %v696_v29, %v2756_v0 }
 0x165   : > { %v1074_v35 = vmax.f32 %v872_v2, 0.0  ;;  %v786_v47 = vadd.f32 %v785_v22, %v2758_v1 }
 0x166   : > { %v1075_v33 = vmax.f32 %v961_v6, 0.0  ;;  %1399 = vmatmul.bf16.gmra.mxu0 %v2843_v57  ;;  %v1076_v61 = vmax.f32 %v697_v45, 0.0 }
 0x167   : > { %1488 = vmatmul.bf16.gmra.mxu1 %v2846_v59  ;;  %1577 = vmatmul.bf16.gmra.mxu2 %v2852_v13  ;;  %v2994_v36 = vpack.c.bf16 %v1074_v35, %v1070_v31  ;;  %v1077_v63 = vmax.f32 %v786_v47, 0.0 }
 0x168   : > { %1666 = vmatmul.bf16.gmra.mxu3 %v2863_v18  ;;  %v2997_v44 = vpack.c.bf16 %v1075_v33, %v1071_v32 }
 0x16a   : > { %v874_v46 = vpop.f32.mrf.mxu2 }
 0x16b   : > { %v963_v48 = vpop.f32.mrf.mxu3  ;;  %v698_v55 = vpop.f32.mrf.mxu0  ;;  %v875_v18 = vadd.f32 %v874_v46, %v2772_v12 }
 0x16c   : > { %v699_v56 = vadd.f32 %v698_v55, %v2756_v0  ;;  %v787_v57 = vpop.f32.mrf.mxu1  ;;  %v964_v26 = vadd.f32 %v963_v48, %v2775_v15 }
 0x16d   : > { %v788_v59 = vadd.f32 %v787_v57, %v2758_v1  ;;  %v1078_v23 = vmax.f32 %v875_v18, 0.0 }
 0x16e   : > { %v1080_v13 = vmax.f32 %v699_v56, 0.0  ;;  %v1079_v25 = vmax.f32 %v964_v26, 0.0 }
 0x16f   : > { %v1081_v7 = vmax.f32 %v788_v59, 0.0 }
 0x170   : > { %v3003_v8 = vpack.c.bf16 %v1080_v13, %v1076_v61 }
 0x171   : > { %v3006_v24 = vpack.c.bf16 %v1081_v7, %v1077_v63 }
 0x172   : > { %v876_v9 = vpop.f32.mrf.mxu2 }
 0x173   : > { %v877_v41 = vadd.f32 %v876_v9, %v2772_v12  ;;  %v965_v10 = vpop.f32.mrf.mxu3  ;;  %v701_v17 = vpop.f32.mrf.mxu0 }
 0x174   : > { %v966_v42 = vadd.f32 %v965_v10, %v2775_v15  ;;  %v790_v51 = vpop.f32.mrf.mxu1  ;;  %v702_v31 = vadd.f32 %v701_v17, %v2756_v0 }
 0x175   : > { %v1082_v2 = vmax.f32 %v877_v41, 0.0  ;;  %v791_v32 = vadd.f32 %v790_v51, %v2758_v1 }
 0x176   : > { %v1083_v29 = vmax.f32 %v966_v42, 0.0  ;;  %1404 = vmatmul.bf16.gmra.mxu0 %v2872_v38  ;;  %v1084_v47 = vmax.f32 %v702_v31, 0.0 }
 0x177   : > { %1493 = vmatmul.bf16.gmra.mxu1 %v2875_v40  ;;  %1582 = vmatmul.bf16.gmra.mxu2 %v2881_v58  ;;  %v3014_v6 = vpack.c.bf16 %v1082_v2, %v1078_v23  ;;  %v1085_v48 = vmax.f32 %v791_v32, 0.0 }
 0x178   : > { %1671 = vmatmul.bf16.gmra.mxu3 %v2883_v60  ;;  %v3017_v22 = vpack.c.bf16 %v1083_v29, %v1079_v25 }
 0x17a   : > { %v879_v35 = vpop.f32.mrf.mxu2 }
 0x17b   : > { %v968_v33 = vpop.f32.mrf.mxu3  ;;  %v703_v45 = vpop.f32.mrf.mxu0  ;;  %v880_v60 = vadd.f32 %v879_v35, %v2772_v12 }
 0x17c   : > { %v704_v46 = vadd.f32 %v703_v45, %v2756_v0  ;;  %v792_v38 = vpop.f32.mrf.mxu1  ;;  %v969_v59 = vadd.f32 %v968_v33, %v2775_v15 }
 0x17d   : > { %v793_v40 = vadd.f32 %v792_v38, %v2758_v1  ;;  %v1086_v9 = vmax.f32 %v880_v60, 0.0 }
 0x17e   : > { %v1088_v58 = vmax.f32 %v704_v46, 0.0  ;;  %v1087_v10 = vmax.f32 %v969_v59, 0.0 }
 0x17f   : > { %v1089_v55 = vmax.f32 %v793_v40, 0.0 }
 0x180   : > { %v3023_v56 = vpack.c.bf16 %v1088_v58, %v1084_v47 }
 0x181   : > { %v3026_v57 = vpack.c.bf16 %v1089_v55, %v1085_v48 }
 0x182   : > { %v881_v61 = vpop.f32.mrf.mxu2 }
 0x183   : > { %v882_v13 = vadd.f32 %v881_v61, %v2772_v12  ;;  %v970_v63 = vpop.f32.mrf.mxu3  ;;  %v706_v7 = vpop.f32.mrf.mxu0 }
 0x184   : > { %v971_v18 = vadd.f32 %v970_v63, %v2775_v15  ;;  %v795_v26 = vpop.f32.mrf.mxu1  ;;  %v707_v23 = vadd.f32 %v706_v7, %v2756_v0 }
 0x185   : > { %v1090_v41 = vmax.f32 %v882_v13, 0.0  ;;  %v796_v25 = vadd.f32 %v795_v26, %v2758_v1 }
 0x186   : > { %v1091_v17 = vmax.f32 %v971_v18, 0.0  ;;  %1409 = vmatmul.bf16.gmra.mxu0 %v2889_v16  ;;  %v1092_v32 = vmax.f32 %v707_v23, 0.0 }
 0x187   : > { %1498 = vmatmul.bf16.gmra.mxu1 %v2892_v19  ;;  %1587 = vmatmul.bf16.gmra.mxu2 %v2898_v39  ;;  %v3034_v42 = vpack.c.bf16 %v1090_v41, %v1086_v9  ;;  %v1093_v33 = vmax.f32 %v796_v25, 0.0 }
 0x188   : > { %1676 = vmatmul.bf16.gmra.mxu3 %v2900_v43  ;;  %v3037_v51 = vpack.c.bf16 %v1091_v17, %v1087_v10 }
 0x18a   : > { %v884_v2 = vpop.f32.mrf.mxu2 }
 0x18b   : > { %v973_v29 = vpop.f32.mrf.mxu3  ;;  %v708_v31 = vpop.f32.mrf.mxu0  ;;  %v885_v43 = vadd.f32 %v884_v2, %v2772_v12 }
 0x18c   : > { %v709_v35 = vadd.f32 %v708_v31, %v2756_v0  ;;  %v797_v16 = vpop.f32.mrf.mxu1  ;;  %v974_v40 = vadd.f32 %v973_v29, %v2775_v15 }
 0x18d   : > { %v798_v19 = vadd.f32 %v797_v16, %v2758_v1  ;;  %v1094_v61 = vmax.f32 %v885_v43, 0.0 }
 0x18e   : > { %v1096_v39 = vmax.f32 %v709_v35, 0.0  ;;  %v1095_v63 = vmax.f32 %v974_v40, 0.0 }
 0x18f   : > { %v1097_v45 = vmax.f32 %v798_v19, 0.0 }
 0x190   : > { %v3043_v46 = vpack.c.bf16 %v1096_v39, %v1092_v32 }
 0x191   : > { %v3046_v38 = vpack.c.bf16 %v1097_v45, %v1093_v33 }
 0x192   : > { %v886_v47 = vpop.f32.mrf.mxu2 }
 0x193   : > { %v887_v58 = vadd.f32 %v886_v47, %v2772_v12  ;;  %v975_v48 = vpop.f32.mrf.mxu3  ;;  %v711_v55 = vpop.f32.mrf.mxu0 }
 0x194   : > { %v976_v60 = vadd.f32 %v975_v48, %v2775_v15  ;;  %v800_v59 = vpop.f32.mrf.mxu1  ;;  %v712_v9 = vadd.f32 %v711_v55, %v2756_v0 }
 0x195   : > { %v1098_v13 = vmax.f32 %v887_v58, 0.0  ;;  %v801_v10 = vadd.f32 %v800_v59, %v2758_v1 }
 0x196   : > { %v1099_v7 = vmax.f32 %v976_v60, 0.0  ;;  %1414 = vmatmul.bf16.gmra.mxu0 %v2906_v62  ;;  %v1100_v25 = vmax.f32 %v712_v9, 0.0 }
 0x197   : > { %1503 = vmatmul.bf16.gmra.mxu1 %v2909_v3  ;;  %1592 = vmatmul.bf16.gmra.mxu2 %v2915_v27  ;;  %v3054_v18 = vpack.c.bf16 %v1098_v13, %v1094_v61  ;;  %v1101_v29 = vmax.f32 %v801_v10, 0.0 }
 0x198   : > { %1681 = vmatmul.bf16.gmra.mxu3 %v2917_v28  ;;  %v3057_v26 = vpack.c.bf16 %v1099_v7, %v1095_v63 }
 0x19a   : > { %v889_v41 = vpop.f32.mrf.mxu2 }
 0x19b   : > { %v978_v17 = vpop.f32.mrf.mxu3  ;;  %v713_v23 = vpop.f32.mrf.mxu0  ;;  %v890_v28 = vadd.f32 %v889_v41, %v2772_v12 }
 0x19c   : > { %v714_v2 = vadd.f32 %v713_v23, %v2756_v0  ;;  %v802_v62 = vpop.f32.mrf.mxu1  ;;  %v979_v19 = vadd.f32 %v978_v17, %v2775_v15 }
 0x19d   : > { %v803_v3 = vadd.f32 %v802_v62, %v2758_v1  ;;  %v1102_v47 = vmax.f32 %v890_v28, 0.0  ;;  %v3089_v62 = vld [vmem:[%s3244_s4] ss:$0 sm:$0xff] }
 0x19e   : > { %v1104_v27 = vmax.f32 %v714_v2, 0.0  ;;  %v1103_v48 = vmax.f32 %v979_v19, 0.0 }
 0x19f   : > { %v1105_v31 = vmax.f32 %v803_v3, 0.0 }
 0x1a0   : > { %v3063_v35 = vpack.c.bf16 %v1104_v27, %v1100_v25 }
 0x1a1   : > { %v3066_v16 = vpack.c.bf16 %v1105_v31, %v1101_v29 }
 0x1a2   : > { %v891_v32 = vpop.f32.mrf.mxu2 }
 0x1a3   : > { %v892_v39 = vadd.f32 %v891_v32, %v2772_v12  ;;  %v980_v33 = vpop.f32.mrf.mxu3  ;;  %v716_v45 = vpop.f32.mrf.mxu0 }
 0x1a4   : > { %v981_v43 = vadd.f32 %v980_v33, %v2775_v15  ;;  %v805_v40 = vpop.f32.mrf.mxu1  ;;  %v717_v61 = vadd.f32 %v716_v45, %v2756_v0 }
 0x1a5   : > { %v1106_v58 = vmax.f32 %v892_v39, 0.0  ;;  %v806_v63 = vadd.f32 %v805_v40, %v2758_v1 }
 0x1a6   : > { %v1107_v55 = vmax.f32 %v981_v43, 0.0  ;;  %1419 = vmatmul.bf16.gmra.mxu0 %v2923_v50  ;;  %v1108_v10 = vmax.f32 %v717_v61, 0.0 }
 0x1a7   : > { %1508 = vmatmul.bf16.gmra.mxu1 %v2926_v53  ;;  %1597 = vmatmul.bf16.gmra.mxu2 %v2934_v11  ;;  %v3074_v60 = vpack.c.bf16 %v1106_v58, %v1102_v47  ;;  %v1109_v17 = vmax.f32 %v806_v63, 0.0 }
 0x1a8   : > { %1686 = vmatmul.bf16.gmra.mxu3 %v2937_v14  ;;  %v3077_v59 = vpack.c.bf16 %v1107_v55, %v1103_v48 }
 0x1aa   : > { %v894_v13 = vpop.f32.mrf.mxu2 }
 0x1ab   : > { %v983_v7 = vpop.f32.mrf.mxu3  ;;  %v718_v9 = vpop.f32.mrf.mxu0  ;;  %v895_v14 = vadd.f32 %v894_v13, %v2772_v12 }
 0x1ac   : > { %v719_v41 = vadd.f32 %v718_v9, %v2756_v0  ;;  %v807_v50 = vpop.f32.mrf.mxu1  ;;  %v984_v0 = vadd.f32 %v983_v7, %v2775_v15 }
 0x1ad   : > { %v808_v53 = vadd.f32 %v807_v50, %v2758_v1  ;;  %v1110_v19 = vmax.f32 %v895_v14, 0.0 }
 0x1ae   : > { %v1112_v11 = vmax.f32 %v719_v41, 0.0  ;;  %v1111_v33 = vmax.f32 %v984_v0, 0.0 }
 0x1af   : > { %v1113_v23 = vmax.f32 %v808_v53, 0.0 }
 0x1b0   : > { %v3083_v2 = vpack.c.bf16 %v1112_v11, %v1108_v10 }
 0x1b1   : > { %v3091_v3 = vpack.c.bf16 %v1113_v23, %v1109_v17 }
 0x1b2   : > { %v896_v25 = vpop.f32.mrf.mxu2 }
 0x1b3   : > { %v897_v1 = vadd.f32 %v896_v25, %v2772_v12  ;;  %v985_v27 = vpop.f32.mrf.mxu3  ;;  %v1385_v29 = vpop.f32.mrf.mxu0 }
 0x1b4   : > { %v986_v31 = vadd.f32 %v985_v27, %v2775_v15  ;;  %v1474_v28 = vpop.f32.mrf.mxu1  ;;  %v1386_v39 = vadd.f32 %v3089_v62, %v1385_v29 }
 0x1b5   : > { %v1114_v32 = vmax.f32 %v897_v1, 0.0 }
 0x1b6   : > { %v1115_v45 = vmax.f32 %v986_v31, 0.0  ;;  %1424 = vmatmul.bf16.gmra.mxu0 %v2943_v34  ;;  %v1475_v15 = vadd.f32 %v1474_v28, %v1386_v39 }
 0x1b7   : > { %1513 = vmatmul.bf16.gmra.mxu1 %v2946_v37  ;;  %1602 = vmatmul.bf16.gmra.mxu2 %v2954_v4  ;;  %v3101_v12 = vpack.c.bf16 %v1114_v32, %v1110_v19 }
 0x1b8   : > { %1691 = vmatmul.bf16.gmra.mxu3 %v2957_v5  ;;  %v3104_v43 = vpack.c.bf16 %v1115_v45, %v1111_v33 }
 0x1ba   : > { %v1563_v40 = vpop.f32.mrf.mxu2 }
 0x1bb   : > { %v1564_v47 = vadd.f32 %v1563_v40, %v1475_v15  ;;  %v1652_v58 = vpop.f32.mrf.mxu3  ;;  %v1387_v48 = vpop.f32.mrf.mxu0 }
 0x1bc   : > { %v1476_v55 = vpop.f32.mrf.mxu1  ;;  %v1388_v61 = vadd.f32 %v3089_v62, %v1387_v48 }
 0x1bd   : > { %v1653_v34 = vadd.f32 %v1652_v58, %v1564_v47 }
 0x1be   : > { %v1477_v37 = vadd.f32 %v1476_v55, %v1388_v61 }
 0x1bf   : > { %1732 = vst [vmem:[%s3109_s25] sm:$0xff] %v1653_v34 }
 0x1c2   : > { %v1565_v4 = vpop.f32.mrf.mxu2 }
 0x1c3   : > { %v1566_v5 = vadd.f32 %v1565_v4, %v1477_v37  ;;  %v1654_v13 = vpop.f32.mrf.mxu3  ;;  %v1390_v63 = vpop.f32.mrf.mxu0 }
 0x1c4   : > { %v1479_v7 = vpop.f32.mrf.mxu1  ;;  %v1391_v41 = vadd.f32 %v3089_v62, %v1390_v63 }
 0x1c5   : > { %v1655_v9 = vadd.f32 %v1654_v13, %v1566_v5 }
 0x1c6   : > { %1429 = vmatmul.bf16.gmra.mxu0 %v2963_v30  ;;  %v1480_v50 = vadd.f32 %v1479_v7, %v1391_v41 }
 0x1c7   : > { %1733 = vst [vmem:[%s3109_s25 + $0x8] sm:$0xff] %v1655_v9  ;;  %1518 = vmatmul.bf16.gmra.mxu1 %v2966_v20  ;;  %1607 = vmatmul.bf16.gmra.mxu2 %v2974_v52 }
 0x1c8   : > { %1696 = vmatmul.bf16.gmra.mxu3 %v2977_v54 }
 0x1ca   : > { %v1568_v53 = vpop.f32.mrf.mxu2 }
 0x1cb   : > { %v1569_v10 = vadd.f32 %v1568_v53, %v1480_v50  ;;  %v1657_v11 = vpop.f32.mrf.mxu3  ;;  %v1392_v17 = vpop.f32.mrf.mxu0 }
 0x1cc   : > { %v1481_v23 = vpop.f32.mrf.mxu1  ;;  %v1393_v0 = vadd.f32 %v3089_v62, %v1392_v17 }
 0x1cd   : > { %v1658_v14 = vadd.f32 %v1657_v11, %v1569_v10 }
 0x1ce   : > { %v1482_v25 = vadd.f32 %v1481_v23, %v1393_v0 }
 0x1cf   : > { %1734 = vst [vmem:[%s3109_s25 + $0x10] sm:$0xff] %v1658_v14 }
 0x1d2   : > { %v1570_v30 = vpop.f32.mrf.mxu2 }
 0x1d3   : > { %v1571_v1 = vadd.f32 %v1570_v30, %v1482_v25  ;;  %v1659_v27 = vpop.f32.mrf.mxu3  ;;  %v1395_v20 = vpop.f32.mrf.mxu0 }
 0x1d4   : > { %v1484_v29 = vpop.f32.mrf.mxu1  ;;  %v1396_v54 = vadd.f32 %v3089_v62, %v1395_v20 }
 0x1d5   : > { %v1660_v52 = vadd.f32 %v1659_v27, %v1571_v1 }
 0x1d6   : > { %1434 = vmatmul.bf16.gmra.mxu0 %v2983_v21  ;;  %v1485_v31 = vadd.f32 %v1484_v29, %v1396_v54 }
 0x1d7   : > { %1735 = vst [vmem:[%s3109_s25 + $0x18] sm:$0xff] %v1660_v52  ;;  %1523 = vmatmul.bf16.gmra.mxu1 %v2986_v49  ;;  %1612 = vmatmul.bf16.gmra.mxu2 %v2994_v36 }
 0x1d8   : > { %1701 = vmatmul.bf16.gmra.mxu3 %v2997_v44 }
 0x1da   : > { %v1573_v28 = vpop.f32.mrf.mxu2 }
 0x1db   : > { %v1574_v19 = vadd.f32 %v1573_v28, %v1485_v31  ;;  %v1662_v32 = vpop.f32.mrf.mxu3  ;;  %v1397_v39 = vpop.f32.mrf.mxu0 }
 0x1dc   : > { %v1486_v33 = vpop.f32.mrf.mxu1  ;;  %v1398_v15 = vadd.f32 %v3089_v62, %v1397_v39 }
 0x1dd   : > { %v1663_v45 = vadd.f32 %v1662_v32, %v1574_v19 }
 0x1de   : > { %v1487_v40 = vadd.f32 %v1486_v33, %v1398_v15 }
 0x1df   : > { %1736 = vst [vmem:[%s3109_s25 + $0x20] sm:$0xff] %v1663_v45 }
 0x1e2   : > { %v1575_v21 = vpop.f32.mrf.mxu2 }
 0x1e3   : > { %v1576_v47 = vadd.f32 %v1575_v21, %v1487_v40  ;;  %v1664_v58 = vpop.f32.mrf.mxu3  ;;  %v1400_v49 = vpop.f32.mrf.mxu0 }
 0x1e4   : > { %v1489_v48 = vpop.f32.mrf.mxu1  ;;  %v1401_v44 = vadd.f32 %v3089_v62, %v1400_v49 }
 0x1e5   : > { %v1665_v36 = vadd.f32 %v1664_v58, %v1576_v47 }
 0x1e6   : > { %1439 = vmatmul.bf16.gmra.mxu0 %v3003_v8  ;;  %v1490_v55 = vadd.f32 %v1489_v48, %v1401_v44 }
 0x1e7   : > { %1737 = vst [vmem:[%s3109_s25 + $0x28] sm:$0xff] %v1665_v36  ;;  %1528 = vmatmul.bf16.gmra.mxu1 %v3006_v24  ;;  %1617 = vmatmul.bf16.gmra.mxu2 %v3014_v6 }
 0x1e8   : > { %1706 = vmatmul.bf16.gmra.mxu3 %v3017_v22 }
 0x1ea   : > { %v1578_v34 = vpop.f32.mrf.mxu2 }
 0x1eb   : > { %v1579_v61 = vadd.f32 %v1578_v34, %v1490_v55  ;;  %v1667_v37 = vpop.f32.mrf.mxu3  ;;  %v1402_v4 = vpop.f32.mrf.mxu0 }
 0x1ec   : > { %v1491_v5 = vpop.f32.mrf.mxu1  ;;  %v1403_v63 = vadd.f32 %v3089_v62, %v1402_v4 }
 0x1ed   : > { %v1668_v13 = vadd.f32 %v1667_v37, %v1579_v61 }
 0x1ee   : > { %v1492_v7 = vadd.f32 %v1491_v5, %v1403_v63 }
 0x1ef   : > { %1738 = vst [vmem:[%s3109_s25 + $0x30] sm:$0xff] %v1668_v13 }
 0x1f2   : > { %v1580_v8 = vpop.f32.mrf.mxu2 }
 0x1f3   : > { %v1581_v9 = vadd.f32 %v1580_v8, %v1492_v7  ;;  %v1669_v41 = vpop.f32.mrf.mxu3  ;;  %v1405_v24 = vpop.f32.mrf.mxu0 }
 0x1f4   : > { %v1494_v50 = vpop.f32.mrf.mxu1  ;;  %v1406_v22 = vadd.f32 %v3089_v62, %v1405_v24 }
 0x1f5   : > { %v1670_v6 = vadd.f32 %v1669_v41, %v1581_v9 }
 0x1f6   : > { %1444 = vmatmul.bf16.gmra.mxu0 %v3023_v56  ;;  %v1495_v53 = vadd.f32 %v1494_v50, %v1406_v22 }
 0x1f7   : > { %1739 = vst [vmem:[%s3109_s25 + $0x38] sm:$0xff] %v1670_v6  ;;  %1533 = vmatmul.bf16.gmra.mxu1 %v3026_v57  ;;  %1622 = vmatmul.bf16.gmra.mxu2 %v3034_v42 }
 0x1f8   : > { %1711 = vmatmul.bf16.gmra.mxu3 %v3037_v51 }
 0x1fa   : > { %v1583_v10 = vpop.f32.mrf.mxu2 }
 0x1fb   : > { %v1584_v11 = vadd.f32 %v1583_v10, %v1495_v53  ;;  %v1672_v17 = vpop.f32.mrf.mxu3  ;;  %v1407_v23 = vpop.f32.mrf.mxu0 }
 0x1fc   : > { %v1496_v14 = vpop.f32.mrf.mxu1  ;;  %v1408_v25 = vadd.f32 %v3089_v62, %v1407_v23 }
 0x1fd   : > { %v1673_v0 = vadd.f32 %v1672_v17, %v1584_v11 }
 0x1fe   : > { %v1497_v30 = vadd.f32 %v1496_v14, %v1408_v25 }
 0x1ff   : > { %1740 = vst [vmem:[%s3109_s25 + $0x40] sm:$0xff] %v1673_v0 }
 0x202   : > { %v1585_v56 = vpop.f32.mrf.mxu2 }
 0x203   : > { %v1586_v1 = vadd.f32 %v1585_v56, %v1497_v30  ;;  %v1674_v27 = vpop.f32.mrf.mxu3  ;;  %v1410_v57 = vpop.f32.mrf.mxu0 }
 0x204   : > { %v1499_v20 = vpop.f32.mrf.mxu1  ;;  %v1411_v51 = vadd.f32 %v3089_v62, %v1410_v57 }
 0x205   : > { %v1675_v42 = vadd.f32 %v1674_v27, %v1586_v1 }
 0x206   : > { %1449 = vmatmul.bf16.gmra.mxu0 %v3043_v46  ;;  %v1500_v29 = vadd.f32 %v1499_v20, %v1411_v51 }
 0x207   : > { %1741 = vst [vmem:[%s3109_s25 + $0x48] sm:$0xff] %v1675_v42  ;;  %1538 = vmatmul.bf16.gmra.mxu1 %v3046_v38  ;;  %1627 = vmatmul.bf16.gmra.mxu2 %v3054_v18 }
 0x208   : > { %1716 = vmatmul.bf16.gmra.mxu3 %v3057_v26 }
 0x20a   : > { %v1588_v52 = vpop.f32.mrf.mxu2 }
 0x20b   : > { %v1589_v54 = vadd.f32 %v1588_v52, %v1500_v29  ;;  %v1677_v31 = vpop.f32.mrf.mxu3  ;;  %v1412_v28 = vpop.f32.mrf.mxu0 }
 0x20c   : > { %v1501_v19 = vpop.f32.mrf.mxu1  ;;  %v1413_v39 = vadd.f32 %v3089_v62, %v1412_v28 }
 0x20d   : > { %v1678_v32 = vadd.f32 %v1677_v31, %v1589_v54 }
 0x20e   : > { %v1502_v33 = vadd.f32 %v1501_v19, %v1413_v39 }
 0x20f   : > { %1742 = vst [vmem:[%s3109_s25 + $0x50] sm:$0xff] %v1678_v32 }
 0x212   : > { %v1590_v46 = vpop.f32.mrf.mxu2 }
 0x213   : > { %v1591_v45 = vadd.f32 %v1590_v46, %v1502_v33  ;;  %v1679_v15 = vpop.f32.mrf.mxu3  ;;  %v1415_v38 = vpop.f32.mrf.mxu0 }
 0x214   : > { %v1504_v40 = vpop.f32.mrf.mxu1  ;;  %v1416_v26 = vadd.f32 %v3089_v62, %v1415_v38 }
 0x215   : > { %v1680_v18 = vadd.f32 %v1679_v15, %v1591_v45 }
 0x216   : > { %1454 = vmatmul.bf16.gmra.mxu0 %v3063_v35  ;;  %v1505_v21 = vadd.f32 %v1504_v40, %v1416_v26 }
 0x217   : > { %1743 = vst [vmem:[%s3109_s25 + $0x58] sm:$0xff] %v1680_v18  ;;  %1543 = vmatmul.bf16.gmra.mxu1 %v3066_v16  ;;  %1632 = vmatmul.bf16.gmra.mxu2 %v3074_v60 }
 0x218   : > { %1721 = vmatmul.bf16.gmra.mxu3 %v3077_v59 }
 0x21a   : > { %v1593_v47 = vpop.f32.mrf.mxu2 }
 0x21b   : > { %v1594_v58 = vadd.f32 %v1593_v47, %v1505_v21  ;;  %v1682_v49 = vpop.f32.mrf.mxu3  ;;  %v1417_v48 = vpop.f32.mrf.mxu0 }
 0x21c   : > { %v1506_v36 = vpop.f32.mrf.mxu1  ;;  %v1418_v55 = vadd.f32 %v3089_v62, %v1417_v48 }
 0x21d   : > { %v1683_v44 = vadd.f32 %v1682_v49, %v1594_v58 }
 0x21e   : > { %v1507_v34 = vadd.f32 %v1506_v36, %v1418_v55 }
 0x21f   : > { %1744 = vst [vmem:[%s3109_s25 + $0x60] sm:$0xff] %v1683_v44 }
 0x222   : > { %v1595_v35 = vpop.f32.mrf.mxu2 }
 0x223   : > { %v1596_v61 = vadd.f32 %v1595_v35, %v1507_v34  ;;  %v1684_v37 = vpop.f32.mrf.mxu3  ;;  %v1420_v16 = vpop.f32.mrf.mxu0 }
 0x224   : > { %v1509_v4 = vpop.f32.mrf.mxu1  ;;  %v1421_v59 = vadd.f32 %v3089_v62, %v1420_v16 }
 0x225   : > { %v1685_v60 = vadd.f32 %v1684_v37, %v1596_v61 }
 0x226   : > { %1459 = vmatmul.bf16.gmra.mxu0 %v3083_v2  ;;  %v1510_v5 = vadd.f32 %v1509_v4, %v1421_v59 }
 0x227   : > { %1745 = vst [vmem:[%s3109_s25 + $0x68] sm:$0xff] %v1685_v60  ;;  %1548 = vmatmul.bf16.gmra.mxu1 %v3091_v3  ;;  %1637 = vmatmul.bf16.gmra.mxu2 %v3101_v12 }
 0x228   : > { %1726 = vmatmul.bf16.gmra.mxu3 %v3104_v43 }
 0x22a   : > { %v1598_v13 = vpop.f32.mrf.mxu2 }
 0x22b   : > { %v1599_v63 = vadd.f32 %v1598_v13, %v1510_v5  ;;  %v1687_v7 = vpop.f32.mrf.mxu3  ;;  %v1422_v8 = vpop.f32.mrf.mxu0 }
 0x22c   : > { %v1511_v9 = vpop.f32.mrf.mxu1  ;;  %v1423_v24 = vadd.f32 %v3089_v62, %v1422_v8 }
 0x22d   : > { %v1688_v41 = vadd.f32 %v1687_v7, %v1599_v63 }
 0x22e   : > { %v1512_v50 = vadd.f32 %v1511_v9, %v1423_v24 }
 0x22f   : > { %1746 = vst [vmem:[%s3109_s25 + $0x70] sm:$0xff] %v1688_v41 }
 0x232   : > { %v1600_v2 = vpop.f32.mrf.mxu2 }
 0x233   : > { %v1601_v6 = vadd.f32 %v1600_v2, %v1512_v50  ;;  %v1689_v3 = vpop.f32.mrf.mxu3  ;;  %v1425_v22 = vpop.f32.mrf.mxu0 }
 0x234   : > { %v1514_v12 = vpop.f32.mrf.mxu1  ;;  %v1426_v43 = vadd.f32 %v3089_v62, %v1425_v22 }
 0x235   : > { %v1690_v53 = vadd.f32 %v1689_v3, %v1601_v6 }
 0x236   : > { %v1515_v10 = vadd.f32 %v1514_v12, %v1426_v43 }
 0x237   : > { %1747 = vst [vmem:[%s3109_s25 + $0x78] sm:$0xff] %v1690_v53 }
 0x23a   : > { %v1603_v11 = vpop.f32.mrf.mxu2 }
 0x23b   : > { %v1604_v17 = vadd.f32 %v1603_v11, %v1515_v10  ;;  %v1692_v23 = vpop.f32.mrf.mxu3  ;;  %v1427_v14 = vpop.f32.mrf.mxu0 }
 0x23c   : > { %v1516_v0 = vpop.f32.mrf.mxu1  ;;  %v1428_v30 = vadd.f32 %v3089_v62, %v1427_v14 }
 0x23d   : > { %v1693_v25 = vadd.f32 %v1692_v23, %v1604_v17 }
 0x23e   : > { %v1517_v56 = vadd.f32 %v1516_v0, %v1428_v30 }
 0x23f   : > { %1748 = vst [vmem:[%s3109_s25 + $0x80] sm:$0xff] %v1693_v25 }
 0x242   : > { %v1605_v1 = vpop.f32.mrf.mxu2 }
 0x243   : > { %v1606_v27 = vadd.f32 %v1605_v1, %v1517_v56  ;;  %v1694_v57 = vpop.f32.mrf.mxu3  ;;  %v1430_v20 = vpop.f32.mrf.mxu0 }
 0x244   : > { %v1519_v42 = vpop.f32.mrf.mxu1  ;;  %v1431_v29 = vadd.f32 %v3089_v62, %v1430_v20 }
 0x245   : > { %v1695_v51 = vadd.f32 %v1694_v57, %v1606_v27 }
 0x246   : > { %v1520_v52 = vadd.f32 %v1519_v42, %v1431_v29 }
 0x247   : > { %1749 = vst [vmem:[%s3109_s25 + $0x88] sm:$0xff] %v1695_v51 }
 0x24a   : > { %v1608_v54 = vpop.f32.mrf.mxu2 }
 0x24b   : > { %v1609_v31 = vadd.f32 %v1608_v54, %v1520_v52  ;;  %v1697_v28 = vpop.f32.mrf.mxu3  ;;  %v1432_v19 = vpop.f32.mrf.mxu0 }
 0x24c   : > { %v1521_v32 = vpop.f32.mrf.mxu1  ;;  %v1433_v33 = vadd.f32 %v3089_v62, %v1432_v19 }
 0x24d   : > { %v1698_v39 = vadd.f32 %v1697_v28, %v1609_v31 }
 0x24e   : > { %v1522_v46 = vadd.f32 %v1521_v32, %v1433_v33 }
 0x24f   : > { %1750 = vst [vmem:[%s3109_s25 + $0x90] sm:$0xff] %v1698_v39 }
 0x252   : > { %v1610_v45 = vpop.f32.mrf.mxu2 }
 0x253   : > { %v1611_v15 = vadd.f32 %v1610_v45, %v1522_v46  ;;  %v1699_v38 = vpop.f32.mrf.mxu3  ;;  %v1435_v40 = vpop.f32.mrf.mxu0 }
 0x254   : > { %v1524_v18 = vpop.f32.mrf.mxu1  ;;  %v1436_v21 = vadd.f32 %v3089_v62, %v1435_v40 }
 0x255   : > { %v1700_v26 = vadd.f32 %v1699_v38, %v1611_v15 }
 0x256   : > { %v1525_v47 = vadd.f32 %v1524_v18, %v1436_v21 }
 0x257   : > { %1751 = vst [vmem:[%s3109_s25 + $0x98] sm:$0xff] %v1700_v26 }
 0x25a   : > { %v1613_v58 = vpop.f32.mrf.mxu2 }
 0x25b   : > { %v1614_v49 = vadd.f32 %v1613_v58, %v1525_v47  ;;  %v1702_v48 = vpop.f32.mrf.mxu3  ;;  %v1437_v36 = vpop.f32.mrf.mxu0 }
 0x25c   : > { %v1526_v44 = vpop.f32.mrf.mxu1  ;;  %v1438_v34 = vadd.f32 %v3089_v62, %v1437_v36 }
 0x25d   : > { %v1703_v55 = vadd.f32 %v1702_v48, %v1614_v49 }
 0x25e   : > { %v1527_v35 = vadd.f32 %v1526_v44, %v1438_v34 }
 0x25f   : > { %1752 = vst [vmem:[%s3109_s25 + $0xa0] sm:$0xff] %v1703_v55 }
 0x262   : > { %v1615_v61 = vpop.f32.mrf.mxu2 }
 0x263   : > { %v1616_v37 = vadd.f32 %v1615_v61, %v1527_v35  ;;  %v1704_v16 = vpop.f32.mrf.mxu3  ;;  %v1440_v4 = vpop.f32.mrf.mxu0 }
 0x264   : > { %v1529_v60 = vpop.f32.mrf.mxu1  ;;  %v1441_v5 = vadd.f32 %v3089_v62, %v1440_v4 }
 0x265   : > { %v1705_v59 = vadd.f32 %v1704_v16, %v1616_v37 }
 0x266   : > { %v1530_v13 = vadd.f32 %v1529_v60, %v1441_v5 }
 0x267   : > { %1753 = vst [vmem:[%s3109_s25 + $0xa8] sm:$0xff] %v1705_v59 }
 0x26a   : > { %v1618_v63 = vpop.f32.mrf.mxu2 }
 0x26b   : > { %v1619_v7 = vadd.f32 %v1618_v63, %v1530_v13  ;;  %v1707_v8 = vpop.f32.mrf.mxu3  ;;  %v1442_v9 = vpop.f32.mrf.mxu0 }
 0x26c   : > { %v1531_v41 = vpop.f32.mrf.mxu1  ;;  %v1443_v50 = vadd.f32 %v3089_v62, %v1442_v9 }
 0x26d   : > { %v1708_v24 = vadd.f32 %v1707_v8, %v1619_v7 }
 0x26e   : > { %v1532_v2 = vadd.f32 %v1531_v41, %v1443_v50 }
 0x26f   : > { %1754 = vst [vmem:[%s3109_s25 + $0xb0] sm:$0xff] %v1708_v24 }
 0x272   : > { %v1620_v6 = vpop.f32.mrf.mxu2 }
 0x273   : > { %v1621_v3 = vadd.f32 %v1620_v6, %v1532_v2  ;;  %v1709_v22 = vpop.f32.mrf.mxu3  ;;  %v1445_v12 = vpop.f32.mrf.mxu0 }
 0x274   : > { %v1534_v53 = vpop.f32.mrf.mxu1  ;;  %v1446_v10 = vadd.f32 %v3089_v62, %v1445_v12 }
 0x275   : > { %v1710_v43 = vadd.f32 %v1709_v22, %v1621_v3 }
 0x276   : > { %v1535_v11 = vadd.f32 %v1534_v53, %v1446_v10 }
 0x277   : > { %1755 = vst [vmem:[%s3109_s25 + $0xb8] sm:$0xff] %v1710_v43 }
 0x27a   : > { %v1623_v17 = vpop.f32.mrf.mxu2 }
 0x27b   : > { %v1624_v23 = vadd.f32 %v1623_v17, %v1535_v11  ;;  %v1712_v14 = vpop.f32.mrf.mxu3  ;;  %v1447_v0 = vpop.f32.mrf.mxu0 }
 0x27c   : > { %v1536_v25 = vpop.f32.mrf.mxu1  ;;  %v1448_v56 = vadd.f32 %v3089_v62, %v1447_v0 }
 0x27d   : > { %v1713_v30 = vadd.f32 %v1712_v14, %v1624_v23 }
 0x27e   : > { %v1537_v1 = vadd.f32 %v1536_v25, %v1448_v56 }
 0x27f   : > { %1756 = vst [vmem:[%s3109_s25 + $0xc0] sm:$0xff] %v1713_v30 }
 0x282   : > { %v1625_v27 = vpop.f32.mrf.mxu2 }
 0x283   : > { %v1626_v57 = vadd.f32 %v1625_v27, %v1537_v1  ;;  %v1714_v20 = vpop.f32.mrf.mxu3  ;;  %v1450_v42 = vpop.f32.mrf.mxu0 }
 0x284   : > { %v1539_v51 = vpop.f32.mrf.mxu1  ;;  %v1451_v52 = vadd.f32 %v3089_v62, %v1450_v42 }
 0x285   : > { %v1715_v29 = vadd.f32 %v1714_v20, %v1626_v57 }
 0x286   : > { %v1540_v54 = vadd.f32 %v1539_v51, %v1451_v52 }
 0x287   : > { %1757 = vst [vmem:[%s3109_s25 + $0xc8] sm:$0xff] %v1715_v29 }
 0x28a   : > { %v1628_v31 = vpop.f32.mrf.mxu2 }
 0x28b   : > { %v1629_v28 = vadd.f32 %v1628_v31, %v1540_v54  ;;  %v1717_v19 = vpop.f32.mrf.mxu3  ;;  %v1452_v32 = vpop.f32.mrf.mxu0 }
 0x28c   : > { %v1541_v39 = vpop.f32.mrf.mxu1  ;;  %v1453_v46 = vadd.f32 %v3089_v62, %v1452_v32 }
 0x28d   : > { %v1718_v33 = vadd.f32 %v1717_v19, %v1629_v28 }
 0x28e   : > { %v1542_v45 = vadd.f32 %v1541_v39, %v1453_v46 }
 0x28f   : > { %1758 = vst [vmem:[%s3109_s25 + $0xd0] sm:$0xff] %v1718_v33 }
 0x292   : > { %v1630_v15 = vpop.f32.mrf.mxu2 }
 0x293   : > { %v1631_v38 = vadd.f32 %v1630_v15, %v1542_v45  ;;  %v1719_v40 = vpop.f32.mrf.mxu3  ;;  %v1455_v18 = vpop.f32.mrf.mxu0 }
 0x294   : > { %v1544_v26 = vpop.f32.mrf.mxu1  ;;  %v1456_v47 = vadd.f32 %v3089_v62, %v1455_v18 }
 0x295   : > { %v1720_v21 = vadd.f32 %v1719_v40, %v1631_v38 }
 0x296   : > { %v1545_v58 = vadd.f32 %v1544_v26, %v1456_v47 }
 0x297   : > { %1759 = vst [vmem:[%s3109_s25 + $0xd8] sm:$0xff] %v1720_v21 }
 0x29a   : > { %v1633_v49 = vpop.f32.mrf.mxu2 }
 0x29b   : > { %v1634_v48 = vadd.f32 %v1633_v49, %v1545_v58  ;;  %v1722_v36 = vpop.f32.mrf.mxu3  ;;  %v1457_v44 = vpop.f32.mrf.mxu0 }
 0x29c   : > { %v1546_v55 = vpop.f32.mrf.mxu1  ;;  %v1458_v35 = vadd.f32 %v3089_v62, %v1457_v44 }
 0x29d   : > { %v1723_v34 = vadd.f32 %v1722_v36, %v1634_v48 }
 0x29e   : > { %v1547_v61 = vadd.f32 %v1546_v55, %v1458_v35 }
 0x29f   : > { %1760 = vst [vmem:[%s3109_s25 + $0xe0] sm:$0xff] %v1723_v34 }
 0x2a2   : > { %v1635_v37 = vpop.f32.mrf.mxu2 }
 0x2a3   : > { %v1636_v16 = vadd.f32 %v1635_v37, %v1547_v61  ;;  %v1724_v4 = vpop.f32.mrf.mxu3  ;;  %v1460_v60 = vpop.f32.mrf.mxu0 }
 0x2a4   : > { %v1461_v5 = vadd.f32 %v3089_v62, %v1460_v60  ;;  %v1549_v13 = vpop.f32.mrf.mxu1 }
 0x2a5   : > { %v1725_v59 = vadd.f32 %v1724_v4, %v1636_v16 }
 0x2a6   : > { %v1550_v63 = vadd.f32 %v1549_v13, %v1461_v5 }
 0x2a7   : > { %1761 = vst [vmem:[%s3109_s25 + $0xe8] sm:$0xff] %v1725_v59 }
 0x2aa   : > { %v1638_v7 = vpop.f32.mrf.mxu2 }
 0x2ab   : > { %v1639_v8 = vadd.f32 %v1638_v7, %v1550_v63  ;;  %v1727_v9 = vpop.f32.mrf.mxu3  ;;  %v1462_v41 = vpop.f32.mrf.mxu0 }
 0x2ac   : > { %v1463_v50 = vadd.f32 %v3089_v62, %v1462_v41  ;;  %v1551_v2 = vpop.f32.mrf.mxu1 }
 0x2ad   : > { %v1728_v24 = vadd.f32 %v1727_v9, %v1639_v8 }
 0x2ae   : > { %v1552_v6 = vadd.f32 %v1551_v2, %v1463_v50 }
 0x2af   : > { %1762 = vst [vmem:[%s3109_s25 + $0xf0] sm:$0xff] %v1728_v24 }
 0x2b2   : > { %v1640_v3 = vpop.f32.mrf.mxu2 }
 0x2b3   : > { %v1641_v22 = vadd.f32 %v1640_v3, %v1552_v6  ;;  %v1729_v12 = vpop.f32.mrf.mxu3 }
 0x2b5   : > { %v1730_v53 = vadd.f32 %v1729_v12, %v1641_v22 }
 0x2b7   : > { %1763 = vst [vmem:[%s3109_s25 + $0xf8] sm:$0xff] %v1730_v53 }
 0x2b8   : > { %2346 = shalt.err (!%p2343_p5)
}
 0x2b9   : > { %s2399_s17 = smov 128   ;;  %s2400_s25 = smov 8  }
 0x2ba   : > { %2261 = dma.vmem_to_hbm [thread:$0]  (%p2471_p4), %s1778_s9, 4096, %s1780_s10, %s1765_s21, %s2399_s17, %s2399_s17, %s2400_s25  }
 0x2bb PF: > { %p2267_p6 = scmp.ge.s32.totalorder %s2397_s23, 2  ;;  %s1794_s29 = sand.u32 1, %s2377_s18  }
 0x2bc   : > { %s1795_s7 = scalar_lea.sflag [#allocation3], %s1794_s29 }
 0x2bd   : > { %p2264_p7 = pnand %p2267_p6, %p2478_p8 }
 0x2bf   : > { %p2265_p9 = pneg %p2264_p7 }
 0x2c1   : > { %2372 = dma.done.wait (%p2265_p9), %s1795_s7, 4096  }
 0x2c2   : > { %2374 = vsyncadd (%p2265_p9), %s1795_s7, 4294963200  ;;  %s18_s23 = sadd.s32 1, %s2397_s23   ;;  %s3248_s18 = smov %s2381_s19 }
 0x2c3   : > { %p15_p10 = scmp.ge.s32.totalorder %s18_s23, 4   ;;  %s3249_s19 = smov %s2385_s20 }
 0x2c4   : > { %s3250_s20 = smov %s2484_s6  ;;  %s3251_s21 = smov %s2393_s22 }
 0x2c5   : > { %s3252_s22 = smov %s3254_s26  ;;  %17 = sbr.rel (!%p15_p10) target bundleno = 4 (0x4), region = 75 }
 0x2ca   :  { %1801 = vsyncpa [#allocation3], 1 }
 0x2cb   :  { %1803 = vsyncpa [#allocation3 + $0x1], 1 }

</bundles_post_ra>
